<compile_context>
chip_gen: v7x
topology: tpu7x:2x2x1
jax: 0.10.0
libtpu: 0.0.40
codegen_flags: <defaults>
</compile_context>

<pallas_src>
import jax
import jax.numpy as jnp
from jax import lax
from jax.experimental import pallas as pl
from jax.experimental.pallas import tpu as pltpu

BN_EPS = 1e-5
C = 512  # channel count out of resnet34[:8]


# ---------------------------------------------------------------------------
# Kernel
# ---------------------------------------------------------------------------
def head_kernel(x_ref, w1_ref, b1_ref, w2_ref, b2_ref, o_ref, pooled_acc):
    """Grid = (batch blocks, hw blocks); hw is the (innermost) reduction axis.

    x_ref:      (B_BLK, HW_BLK, 512) backbone features, channels lane-dense.
    w1_ref:     (512, 512)  fc1 weight (in, out) with BN1 scale and the
                            1/(H*W) of the average pool folded in.
    b1_ref:     (1, 512)    fc1 bias with BN1 shift folded in.
    w2_ref:     (1, 512)    fc2 weight row with BN2 scale folded in.
    b2_ref:     (1, 1)      fc2 bias with BN2 shift folded in.
    o_ref:      (1, 1, B_BLK) lane-dense per-block output (batch on lanes).
    pooled_acc: (B_BLK, 512) f32 VMEM scratch accumulating the spatial sum.
    """
    s = pl.program_id(1)

    @pl.when(s == 0)
    def _():
        pooled_acc[...] = jnp.zeros_like(pooled_acc)

    # x = F.relu(top_model(x)); AdaptiveAvgPool2d((1,1)).
    # 1/HW of the mean is folded into w1, so only a spatial sum is needed.
    # Upcast before the VPU ops so bf16 feature streaming also works on v5e.
    x = x_ref[...].astype(jnp.float32)                            # (B_BLK, HW_BLK, 512)
    pooled_acc[...] += jnp.sum(jnp.maximum(x, 0.0), axis=-2)      # (B_BLK, 512)

    @pl.when(s == pl.num_programs(1) - 1)
    def _():
        # bn1 -> fc1 -> relu  (BN1 + 1/HW folded into w1/b1)  -> MXU matmul.
        h = jnp.dot(pooled_acc[...], w1_ref[...],
                    preferred_element_type=jnp.float32)
        h = jnp.maximum(h + b1_ref[...], 0.0)                     # (B_BLK, 512)

        # bn2 -> fc2 (BN2 folded): contract over channels directly so the
        # result is the lane-dense (1, B_BLK) row with no h.T / XLU transpose.
        out = lax.dot_general(
            w2_ref[...], h,
            dimension_numbers=(((1,), (1,)), ((), ())),
            preferred_element_type=jnp.float32)                   # (1, B_BLK)
        o_ref[0] = (out + b2_ref[0, 0]).astype(o_ref.dtype)


# ---------------------------------------------------------------------------
# Tiling plan
# ---------------------------------------------------------------------------
def _plan_tiles(batch, hw, itemsize, max_buf_bytes=8 * 1024 * 1024,
                max_blk=256):
    """Pick (batch_tile, hw_tile).

    One feature buffer is kept <= ~8 MiB so that, double-buffered plus the
    ~1-2 MiB of parameters and the pooled accumulator, the working set fits
    the 32 MiB scoped VMEM limit and v7x's 64 MiB physical VMEM.  The batch
    tile is a multiple of 128 when possible (unmasked lane-dense output
    stores, full MXU M dim), otherwise a multiple of 8.  If even a 128-row
    tile with the whole spatial extent exceeds the budget, H*W is split over
    a reduction grid axis instead of shrinking the batch tile.
    """
    strip = C * itemsize                     # bytes of one (1, 1, 512) strip
    b_pad8 = -(-batch // 8) * 8

    blk = max_buf_bytes // max(1, hw * strip)
    if blk >= 128:
        blk = min(max_blk, (blk // 128) * 128)
        hw_blk = hw                          # whole spatial extent per block
    else:
        blk = 128                            # split hw so a 128-row tile fits
        hw_blk = max(8, (max_buf_bytes // (blk * strip)) // 8 * 8)
        hw_blk = min(hw_blk, -(-hw // 8) * 8)

    blk = min(blk, max(8, b_pad8))
    if blk >= 128:
        blk = (blk // 128) * 128
    else:
        blk = max(8, (blk // 8) * 8)
    return blk, hw_blk


# ---------------------------------------------------------------------------
# Wrapper
# ---------------------------------------------------------------------------
def net_head_forward(feat_nchw, folded_params, feat_dtype=None):
    """feat_nchw: (B, 512, H, W) backbone feature map (NCHW, PyTorch layout).

    feat_dtype: optionally stream the feature map in a narrower dtype
    (e.g. jnp.bfloat16) to halve the HBM read traffic; the kernel accumulates
    in f32.
    """
    w1f, b1f, w2f, b2f = folded_params
    B, c, H, W = feat_nchw.shape
    assert c == C
    hw = H * W

    # Channels -> lane axis (NHWC-style).  One XLA transpose; free if the
    # backbone already emits NHWC (the TPU-preferred conv layout).
    x = jnp.transpose(feat_nchw, (0, 2, 3, 1)).reshape(B, hw, C)
    if feat_dtype is not None:
        x = x.astype(feat_dtype)

    blk, hw_blk = _plan_tiles(B, hw, x.dtype.itemsize)
    nb = -(-B // blk)
    n_hw = -(-hw // hw_blk)
    b_pad, hw_pad = nb * blk, n_hw * hw_blk
    if b_pad != B or hw_pad != hw:
        # Zero padding is exact: ReLU(0) contributes nothing to the pool and
        # padded batch rows are sliced off below.
        x = jnp.pad(x, ((0, b_pad - B), (0, hw_pad - hw), (0, 0)))

    grid_spec = pltpu.PrefetchScalarGridSpec(
        num_scalar_prefetch=0,
        grid=(nb, n_hw),                     # hw (reduction) axis innermost
        in_specs=[
            # Only the feature block advances with the grid (pipelined).
            pl.BlockSpec((blk, hw_blk, C), lambda i, s: (i, s, 0)),
            # Parameters: constant index_maps -> VMEM-resident across steps.
            pl.BlockSpec((C, C), lambda i, s: (0, 0)),
            pl.BlockSpec((1, C), lambda i, s: (0, 0)),
            pl.BlockSpec((1, C), lambda i, s: (0, 0)),
            pl.BlockSpec((1, 1), lambda i, s: (0, 0)),
        ],
        # Output block is constant across the reduction axis (accumulator
        # pattern); lane-dense (1, 1, blk) row with batch on the lane axis.
        out_specs=pl.BlockSpec((1, 1, blk), lambda i, s: (i, 0, 0)),
        scratch_shapes=[pltpu.VMEM((blk, C), jnp.float32)],
    )

    out = pl.pallas_call(
        head_kernel,
        out_shape=jax.ShapeDtypeStruct((nb, 1, blk), jnp.float32),
        grid_spec=grid_spec,
        compiler_params=pltpu.CompilerParams(
            dimension_semantics=("parallel", "arbitrary"),
            vmem_limit_bytes=32 * 1024 * 1024,
        ),
    )(x, w1f, b1f, w2f, b2f)

    return out.reshape(-1)[:B].reshape(B, 1)


# ---------------------------------------------------------------------------
# Parameters (PyTorch layout) + host-side BN folding
# ---------------------------------------------------------------------------
def make_params(key):
    """Deterministic synthetic parameters matching the PyTorch module shapes."""
    ks = jax.random.split(key, 8)
    w1 = jax.random.normal(ks[0], (C, C), jnp.float32) * 0.02   # (out, in)
    b1 = jax.random.normal(ks[1], (C,), jnp.float32) * 0.01
    w2 = jax.random.normal(ks[2], (1, C), jnp.float32) * 0.02   # (1, 512)
    b2 = jax.random.normal(ks[3], (1,), jnp.float32) * 0.01
    bn1 = jnp.stack([  # [gamma, beta, running_mean, running_var]
        1.0 + 0.1 * jax.random.normal(ks[4], (C,), jnp.float32),
        0.1 * jax.random.normal(ks[5], (C,), jnp.float32),
        0.1 * jax.random.normal(ks[6], (C,), jnp.float32),
        jnp.abs(1.0 + 0.1 * jax.random.normal(ks[7], (C,), jnp.float32)),
    ])
    bn2 = jnp.stack([
        jnp.ones((C,), jnp.float32),
        jnp.zeros((C,), jnp.float32),
        jnp.zeros((C,), jnp.float32),
        jnp.ones((C,), jnp.float32),
    ])
    return {"w1": w1, "b1": b1, "w2": w2, "b2": b2, "bn1": bn1, "bn2": bn2}


def fold_params(params, hw):
    """Fold BN1 (+ 1/HW pooling scale) into fc1 and BN2 into fc2 (eval BN)."""
    g1, be1, m1, v1 = params["bn1"]
    s1 = g1 * jax.lax.rsqrt(v1 + BN_EPS)
    t1 = be1 - m1 * s1
    w1, b1 = params["w1"], params["b1"]          # (out, in), (out,)
    w1f = (w1 * s1[None, :]).T / float(hw)       # (in, out), BN1 + 1/HW folded
    b1f = (b1 + w1 @ t1).reshape(1, C)

    g2, be2, m2, v2 = params["bn2"]
    s2 = g2 * jax.lax.rsqrt(v2 + BN_EPS)
    t2 = be2 - m2 * s2
    w2, b2 = params["w2"], params["b2"]          # (1, 512), (1,)
    w2f = w2 * s2[None, :]                       # (1, 512), BN2 folded
    b2f = (b2 + w2 @ t2).reshape(1, 1)
    return w1f, b1f, w2f, b2f


# ---------------------------------------------------------------------------
# Pure-JAX reference (unfolded) for correctness
# ---------------------------------------------------------------------------
def reference_forward(feat_nchw, params):
    x = jnp.maximum(feat_nchw, 0.0)
    pooled = jnp.mean(x, axis=(2, 3))                            # (B, 512)
    g1, be1, m1, v1 = params["bn1"]
    xb = (pooled - m1) / jnp.sqrt(v1 + BN_EPS) * g1 + be1
    h = jnp.maximum(xb @ params["w1"].T + params["b1"], 0.0)
    g2, be2, m2, v2 = params["bn2"]
    hb = (h - m2) / jnp.sqrt(v2 + BN_EPS) * g2 + be2
    return hb @ params["w2"].T + params["b2"]                    # (B, 1)


if __name__ == "__main__":
    key = jax.random.PRNGKey(0)
    k_feat, k_params = jax.random.split(key)

    # Small example: batch=2, backbone output channels=512, spatial 4x4
    # (what resnet34[:8] would produce for a 128x128 input image).
    feat = jax.random.normal(k_feat, (2, 512, 4, 4), jnp.float32)
    params = make_params(k_params)
    folded = fold_params(params, 4 * 4)

    out = net_head_forward(feat, folded)
    out = jax.block_until_ready(out)

    ref = reference_forward(feat, params)
    assert out.shape == (2, 1)
    assert jnp.allclose(out, ref, atol=1e-4, rtol=1e-4), (out, ref)

    print("KERNEL_OK")
</pallas_src>

<mosaic_0001>
module attributes {stable_mosaic.version = 11 : i64} {
  func.func @head_kernel(%arg0: i32, %arg1: i32, %arg2: memref<8x16x512xf32, #tpu.memory_space<vmem>>, %arg3: memref<512x512xf32, #tpu.memory_space<vmem>>, %arg4: memref<1x512xf32, #tpu.memory_space<vmem>>, %arg5: memref<1x512xf32, #tpu.memory_space<vmem>>, %arg6: memref<1x1xf32, #tpu.memory_space<vmem>>, %arg7: memref<1x1x8xf32, #tpu.memory_space<vmem>>, %arg8: memref<8x512xf32, #tpu.memory_space<vmem>>) attributes {dimension_semantics = [#tpu.dimension_semantics<parallel>, #tpu.dimension_semantics<arbitrary>], iteration_bounds = array<i64: 1, 1>, scalar_prefetch = 0 : i64, scratch_operands = 1 : i64, tpu.core_type = #tpu.core_type<tc>, window_params = [{transform_indices = @transform_0, window_bounds = array<i64: 8, 16, 512>}, {pipeline_mode = #tpu.pipeline_mode<synchronous>, transform_indices = @transform_1, window_bounds = array<i64: 512, 512>}, {pipeline_mode = #tpu.pipeline_mode<synchronous>, transform_indices = @transform_2, window_bounds = array<i64: 1, 512>}, {pipeline_mode = #tpu.pipeline_mode<synchronous>, transform_indices = @transform_3, window_bounds = array<i64: 1, 512>}, {pipeline_mode = #tpu.pipeline_mode<synchronous>, transform_indices = @transform_4, window_bounds = array<i64: 1, 1>}, {transform_indices = @transform_5, window_bounds = array<i64: 1, 1, 8>}]} {
    %c0_i32 = arith.constant 0 : i32
    %0 = arith.cmpi eq, %arg1, %c0_i32 : i32
    %1 = arith.extui %0 : i1 to i32
    %c0_i32_0 = arith.constant 0 : i32
    %2 = arith.cmpi ne, %1, %c0_i32_0 : i32
    scf.if %2 {
      %cst_10 = arith.constant 0.000000e+00 : f32
      %13 = vector.broadcast %cst_10 : f32 to vector<8x512xf32>
      %c0_11 = arith.constant 0 : index
      %c0_12 = arith.constant 0 : index
      %14 = vector.load %arg8[%c0_11, %c0_12] : memref<8x512xf32, #tpu.memory_space<vmem>>, vector<8x512xf32>
      tpu.vector_store %arg8[%c0_11, %c0_12], %13 {strides = array<i32>} : memref<8x512xf32, #tpu.memory_space<vmem>>, vector<8x512xf32>,
    } else {
    }
    %c0 = arith.constant 0 : index
    %c0_1 = arith.constant 0 : index
    %c0_2 = arith.constant 0 : index
    %3 = vector.load %arg2[%c0, %c0_1, %c0_2] : memref<8x16x512xf32, #tpu.memory_space<vmem>>, vector<8x16x512xf32>
    %c0_3 = arith.constant 0 : index
    %c0_4 = arith.constant 0 : index
    %4 = vector.load %arg8[%c0_3, %c0_4] : memref<8x512xf32, #tpu.memory_space<vmem>>, vector<8x512xf32>
    %cst = arith.constant 0.000000e+00 : f32
    %5 = vector.broadcast %cst : f32 to vector<8x16x512xf32>
    %6 = arith.maximumf %3, %5 : vector<8x16x512xf32>
    %cst_5 = arith.constant dense<0.000000e+00> : vector<8x512xf32>
    %7 = vector.multi_reduction <add>, %6, %cst_5 [1] : vector<8x16x512xf32> to vector<8x512xf32>
    %8 = arith.addf %4, %7 : vector<8x512xf32>
    %c0_6 = arith.constant 0 : index
    %c0_7 = arith.constant 0 : index
    %9 = vector.load %arg8[%c0_6, %c0_7] : memref<8x512xf32, #tpu.memory_space<vmem>>, vector<8x512xf32>
    tpu.vector_store %arg8[%c0_6, %c0_7], %8 {strides = array<i32>} : memref<8x512xf32, #tpu.memory_space<vmem>>, vector<8x512xf32>,
    %c0_i32_8 = arith.constant 0 : i32
    %10 = arith.cmpi eq, %arg1, %c0_i32_8 : i32
    %11 = arith.extui %10 : i1 to i32
    %c0_i32_9 = arith.constant 0 : i32
    %12 = arith.cmpi ne, %11, %c0_i32_9 : i32
    scf.if %12 {
      %c0_10 = arith.constant 0 : index
      %c0_11 = arith.constant 0 : index
      %13 = vector.load %arg8[%c0_10, %c0_11] : memref<8x512xf32, #tpu.memory_space<vmem>>, vector<8x512xf32>
      %c0_12 = arith.constant 0 : index
      %c0_13 = arith.constant 0 : index
      %14 = vector.load %arg3[%c0_12, %c0_13] : memref<512x512xf32, #tpu.memory_space<vmem>>, vector<512x512xf32>
      %cst_14 = arith.constant dense<0.000000e+00> : vector<8x512xf32>
      %15 = tpu.matmul %13, %14, %cst_14 {dimension_numbers = #tpu.dot_dimension_numbers<[1], [0], [0], [1], [0, 0, 1, 1], [], []>} : vector<8x512xf32>, vector<512x512xf32>, vector<8x512xf32> -> vector<8x512xf32>
      %c0_15 = arith.constant 0 : index
      %c0_16 = arith.constant 0 : index
      %16 = vector.load %arg4[%c0_15, %c0_16] : memref<1x512xf32, #tpu.memory_space<vmem>>, vector<1x512xf32>
      %17 = vector.broadcast %16 : vector<1x512xf32> to vector<8x512xf32>
      %18 = arith.addf %15, %17 : vector<8x512xf32>
      %cst_17 = arith.constant 0.000000e+00 : f32
      %19 = vector.broadcast %cst_17 : f32 to vector<8x512xf32>
      %20 = arith.maximumf %18, %19 : vector<8x512xf32>
      %c0_18 = arith.constant 0 : index
      %c0_19 = arith.constant 0 : index
      %21 = vector.load %arg5[%c0_18, %c0_19] : memref<1x512xf32, #tpu.memory_space<vmem>>, vector<1x512xf32>
      %cst_20 = arith.constant dense<0.000000e+00> : vector<1x8xf32>
      %22 = tpu.matmul %21, %20, %cst_20 {dimension_numbers = #tpu.dot_dimension_numbers<[1], [1], [0], [0], [0, 0, 1, 0], [], []>} : vector<1x512xf32>, vector<8x512xf32>, vector<1x8xf32> -> vector<1x8xf32>
      %c0_21 = arith.constant 0 : index
      %c0_22 = arith.constant 0 : index
      %23 = vector.load %arg6[%c0_21, %c0_22] : memref<1x1xf32, #tpu.memory_space<vmem>>, vector<1x1xf32>
      %24 = vector.extract %23[0, 0] : f32 from vector<1x1xf32>
      %25 = vector.broadcast %24 : f32 to vector<1x8xf32>
      %26 = arith.addf %22, %25 : vector<1x8xf32>
      %c0_23 = arith.constant 0 : index
      %c0_24 = arith.constant 0 : index
      %c0_25 = arith.constant 0 : index
      %27 = vector.load %arg7[%c0_23, %c0_24, %c0_25] : memref<1x1x8xf32, #tpu.memory_space<vmem>>, vector<1x1x8xf32>
      %28 = vector.shape_cast %27 : vector<1x1x8xf32> to vector<1x8xf32>
      %29 = vector.shape_cast %26 : vector<1x8xf32> to vector<1x1x8xf32>
      tpu.vector_store %arg7[%c0_23, %c0_24, %c0_25], %29 {strides = array<i32>} : memref<1x1x8xf32, #tpu.memory_space<vmem>>, vector<1x1x8xf32>,
    } else {
    }
    return
  }
  func.func @transform_0(%arg0: i32, %arg1: i32) -> (i32, i32, i32) {
    %c0_i32 = arith.constant 0 : i32
    %c0_i32_0 = arith.constant 0 : i32
    return %arg0, %arg1, %c0_i32 : i32, i32, i32
  }
  func.func @transform_1(%arg0: i32, %arg1: i32) -> (i32, i32) {
    %c0_i32 = arith.constant 0 : i32
    %c0_i32_0 = arith.constant 0 : i32
    %c0_i32_1 = arith.constant 0 : i32
    return %c0_i32, %c0_i32_0 : i32, i32
  }
  func.func @transform_2(%arg0: i32, %arg1: i32) -> (i32, i32) {
    %c0_i32 = arith.constant 0 : i32
    %c0_i32_0 = arith.constant 0 : i32
    %c0_i32_1 = arith.constant 0 : i32
    return %c0_i32, %c0_i32_0 : i32, i32
  }
  func.func @transform_3(%arg0: i32, %arg1: i32) -> (i32, i32) {
    %c0_i32 = arith.constant 0 : i32
    %c0_i32_0 = arith.constant 0 : i32
    %c0_i32_1 = arith.constant 0 : i32
    return %c0_i32, %c0_i32_0 : i32, i32
  }
  func.func @transform_4(%arg0: i32, %arg1: i32) -> (i32, i32) {
    %c0_i32 = arith.constant 0 : i32
    %c0_i32_0 = arith.constant 0 : i32
    %c0_i32_1 = arith.constant 0 : i32
    return %c0_i32, %c0_i32_0 : i32, i32
  }
  func.func @transform_5(%arg0: i32, %arg1: i32) -> (i32, i32, i32) {
    %c0_i32 = arith.constant 0 : i32
    %c0_i32_0 = arith.constant 0 : i32
    %c0_i32_1 = arith.constant 0 : i32
    return %arg0, %c0_i32, %c0_i32_0 : i32, i32, i32
  }
}

</mosaic_0001>

<bundles_post_ra>
// kernel: tpu_custom_call.1
= control target key start
LH: loop header
LB: loop body
LE: loop exit
PB: predicated region body
PF: predicated region fallthrough
CT: control target
= control target key end

     0   :  { %s2368_s0 = inlined_call_operand.hbm [shape: f32[8,16,512], index: 0, kind: input, shape index: {}]   ;;  %s2369_s1 = inlined_call_operand.hbm [shape: f32[512,512], index: 1, kind: input, shape index: {}]   ;;  %s2370_s2 = inlined_call_operand.vmem [shape: f32[1,512], index: 2, kind: input, shape index: {}]   ;;  %s2371_s3 = inlined_call_operand.vmem [shape: f32[1,512], index: 3, kind: input, shape index: {}]   ;;  %s2372_s4 = inlined_call_operand.<no memory space> [shape: f32[1,1], index: 4, kind: input, shape index: {}]   ;;  %s2373_s5 = inlined_call_operand.hbm [shape: f32[1,1,8], index: 5, kind: output, shape index: {}]  }
   0x1   :  { %v10_v0 = vstv %s2372_s4 }
   0x2   :  { %11 = vst [vmem:[#allocation3] sm:$0x1] %v10_v0 }
   0x3   :  { %12 = vsyncpa [#allocation5], 0 }
   0x4   :  { %13 = vsyncpa [#allocation8], 0 }
   0x5   :  { %14 = vsyncpa [#allocation6], 0  ;;  %s1595_s20 = smov [#allocation4]   ;;  %s1523_s24 = scalar_lea.hbm %s2368_s0, 8192 }
   0x6   :  { %s20_s21 = sshll.u32 %s1595_s20, 4  ;;  %p1524_p0 = scmp.ne.s32.totalorder %s2368_s0, %s1523_s24  ;;  %s21_s21 = int_to_ptr.vmem [resolvable:$true] %s20_s21 }
   0x7   :  { %p1527_p1 = scmp.lt.u32.totalorder %s1523_s24, %s2368_s0 }
   0x9   :  { %p1529_p2 = pnand %p1527_p1, %p1524_p0 }
   0xb   :  { %1532 = shalt.err (!%p1529_p2)
}
   0xc   :  { %s1533_s4 = scalar_lea.vmem %s21_s21, 8192  ;;  %p1538_p4 = scmp.lt.s32.totalorder %s21_s21, %s21_s21 }
   0xd   :  { %p1534_p3 = scmp.ne.s32.totalorder %s21_s21, %s1533_s4  ;;  %p1539_p5 = scmp.lt.s32.totalorder %s1533_s4, %s1533_s4 }
   0xf   :  { %p1540_p6 = por %p1539_p5, %p1538_p4 }
  0x11   :  { %p1541_p7 = pnand %p1540_p6, %p1534_p3 }
  0x13   :  { %1544 = shalt.err (!%p1541_p7)
}
  0x14   :  { %s1596_s29 = smov 512   ;;  %s1597_s30 = smov 32  }
  0x15   :  { %26 = dma.hbm_to_vmem [thread:$0]  %s2368_s0, 8192, %s21_s21, [#allocation5], %s1596_s29, %s1596_s29, %s1597_s30  }
  0x16   :  { %s1598_s8 = smov [#allocation7]   ;;  %s1545_s12 = scalar_lea.hbm %s2369_s1, 32768 }
  0x17   :  { %s32_s9 = sshll.u32 %s1598_s8, 4  ;;  %p1546_p8 = scmp.ne.s32.totalorder %s2369_s1, %s1545_s12  ;;  %s33_s9 = int_to_ptr.vmem [resolvable:$true] %s32_s9 }
  0x18   :  { %p1549_p9 = scmp.lt.u32.totalorder %s1545_s12, %s2369_s1 }
  0x1a   :  { %p1551_p10 = pnand %p1549_p9, %p1546_p8 }
  0x1c   :  { %1554 = shalt.err (!%p1551_p10)
}
  0x1d   :  { %s1555_s17 = scalar_lea.vmem %s33_s9, 32768  ;;  %p1560_p12 = scmp.lt.s32.totalorder %s33_s9, %s33_s9 }
  0x1e   :  { %p1556_p11 = scmp.ne.s32.totalorder %s33_s9, %s1555_s17  ;;  %p1561_p13 = scmp.lt.s32.totalorder %s1555_s17, %s1555_s17 }
  0x20   :  { %p1562_p0 = por %p1561_p13, %p1560_p12 }
  0x22   :  { %p1563_p1 = pnand %p1562_p0, %p1556_p11 }
  0x24   :  { %1566 = shalt.err (!%p1563_p1)
}
  0x25   :  { %38 = dma.hbm_to_vmem [thread:$0]  %s2369_s1, 32768, %s33_s9, [#allocation8], %s1596_s29, %s1596_s29, %s1597_s30  }
  0x26   :  { %1589 = dma.done.wait [#allocation5], 8192  }
  0x27   :  { %1590 = vsyncadd [#allocation5], 4294959104 }
  0x28   :  { %1591 = dma.done.wait [#allocation8], 32768  }
  0x29   :  { %1592 = vsyncadd [#allocation8], 4294934528  ;;  %v502_v1 = vld [vmem:[#allocation7 + $0x8] sm:$0xff]  ;;  %v504_v3 = vld [vmem:[#allocation7 + $0x18] sm:$0xff]  ;;  %vm447_vm0 = vcmask 1041409   ;;  %vm449_vm1 = vcmask 1042434  }
  0x2a   :  { %v506_v2 = vld [vmem:[#allocation7 + $0x28] sm:$0xff]  ;;  %v508_v5 = vld [vmem:[#allocation7 + $0x38] sm:$0xff]  ;;  %v501_v6 = vld [vmem:[#allocation7] sm:$0xff]  ;;  %vm451_vm2 = vcmask 1043459   ;;  %vm453_vm3 = vcmask 1044484   ;;  %vm455_vm4 = vcmask 1045509  }
  0x2b   :  { %v1250_v4 = vpack.c.bf16 %v506_v2, %v502_v1  ;;  %v505_v7 = vld [vmem:[#allocation7 + $0x20] sm:$0xff]  ;;  %v1378_v8 = vpack.c.bf16 %v508_v5, %v504_v3  ;;  %v503_v10 = vld [vmem:[#allocation7 + $0x10] sm:$0xff]  ;;  %v510_v12 = vld [vmem:[#allocation7 + $0x48] sm:$0xff]  ;;  %vm457_vm5 = vcmask 1046534   ;;  %vm459_vm6 = vcmask 1047559  }
  0x2c   :  { %v1252_v9 = vpack.c.bf16 %v505_v7, %v501_v6  ;;  %v507_v11 = vld [vmem:[#allocation7 + $0x30] sm:$0xff]  ;;  %v514_v14 = vld [vmem:[#allocation7 + $0x68] sm:$0xff]  ;;  %v512_v15 = vld [vmem:[#allocation7 + $0x58] sm:$0xff]  ;;  %vm1232_vm7 = vcmask 57344  }
  0x2d   :  { %1251 = vmatprep.subr.bf16.mxu0 %v1250_v4  ;;  %v1380_v13 = vpack.c.bf16 %v507_v11, %v503_v10  ;;  %v516_v16 = vld [vmem:[#allocation7 + $0x78] sm:$0xff]  ;;  %1379 = vmatprep.subr.bf16.mxu1 %v1378_v8  ;;  %v1254_v17 = vpack.c.bf16 %v514_v14, %v510_v12  ;;  %v509_v19 = vld [vmem:[#allocation7 + $0x40] sm:$0xff]  ;;  %v511_v21 = vld [vmem:[#allocation7 + $0x50] sm:$0xff] }
  0x2e   :  { %1253 = vmatpush1.bf16.msra.mxu0 %v1252_v9  ;;  %v1382_v18 = vpack.c.bf16 %v516_v16, %v512_v15  ;;  %v513_v20 = vld [vmem:[#allocation7 + $0x60] sm:$0xff]  ;;  %v515_v23 = vld [vmem:[#allocation7 + $0x70] sm:$0xff]  ;;  %v518_v24 = vld [vmem:[#allocation7 + $0x88] sm:$0xff] }
  0x2f   :  { %1381 = vmatpush1.bf16.msra.mxu1 %v1380_v13  ;;  %v1256_v22 = vpack.c.bf16 %v513_v20, %v509_v19  ;;  %v522_v25 = vld [vmem:[#allocation7 + $0xa8] sm:$0xff]  ;;  %1255 = vmatprep.subr.bf16.mxu0 %v1254_v17  ;;  %v1384_v26 = vpack.c.bf16 %v515_v23, %v511_v21  ;;  %v520_v28 = vld [vmem:[#allocation7 + $0x98] sm:$0xff]  ;;  %v517_v30 = vld [vmem:[#allocation7 + $0x80] sm:$0xff] }
  0x30   :  { %1383 = vmatprep.subr.bf16.mxu1 %v1382_v18  ;;  %v1258_v27 = vpack.c.bf16 %v522_v25, %v518_v24  ;;  %v524_v29 = vld [vmem:[#allocation7 + $0xb8] sm:$0xff]  ;;  %v521_v32 = vld [vmem:[#allocation7 + $0xa0] sm:$0xff]  ;;  %v519_v33 = vld [vmem:[#allocation7 + $0x90] sm:$0xff] }
  0x31   :  { %v1386_v31 = vpack.c.bf16 %v524_v29, %v520_v28  ;;  %v523_v34 = vld [vmem:[#allocation7 + $0xb0] sm:$0xff]  ;;  %v1260_v35 = vpack.c.bf16 %v521_v32, %v517_v30  ;;  %v526_v36 = vld [vmem:[#allocation7 + $0xc8] sm:$0xff]  ;;  %v528_v38 = vld [vmem:[#allocation7 + $0xd8] sm:$0xff] }
  0x32   :  { %1257 = vmatpush1.bf16.msra.mxu0 %v1256_v22  ;;  %v530_v37 = vld [vmem:[#allocation7 + $0xe8] sm:$0xff]  ;;  %v1388_v39 = vpack.c.bf16 %v523_v34, %v519_v33  ;;  %v532_v41 = vld [vmem:[#allocation7 + $0xf8] sm:$0xff]  ;;  %v525_v42 = vld [vmem:[#allocation7 + $0xc0] sm:$0xff] }
  0x33   :  { %1385 = vmatpush1.bf16.msra.mxu1 %v1384_v26  ;;  %1259 = vmatprep.subr.bf16.mxu0 %v1258_v27  ;;  %v1262_v40 = vpack.c.bf16 %v530_v37, %v526_v36  ;;  %v529_v43 = vld [vmem:[#allocation7 + $0xe0] sm:$0xff]  ;;  %v1390_v44 = vpack.c.bf16 %v532_v41, %v528_v38  ;;  %v527_v45 = vld [vmem:[#allocation7 + $0xd0] sm:$0xff]  ;;  %v534_v47 = vld [vmem:[#allocation7 + $0x108] sm:$0xff] }
  0x34   :  { %1387 = vmatprep.subr.bf16.mxu1 %v1386_v31  ;;  %v531_v46 = vld [vmem:[#allocation7 + $0xf0] sm:$0xff]  ;;  %v538_v48 = vld [vmem:[#allocation7 + $0x128] sm:$0xff]  ;;  %v536_v49 = vld [vmem:[#allocation7 + $0x118] sm:$0xff]  ;;  %v1264_v51 = vpack.c.bf16 %v529_v43, %v525_v42 }
  0x35   :  { %v540_v50 = vld [vmem:[#allocation7 + $0x138] sm:$0xff]  ;;  %v1392_v52 = vpack.c.bf16 %v531_v46, %v527_v45  ;;  %v1266_v53 = vpack.c.bf16 %v538_v48, %v534_v47  ;;  %v533_v54 = vld [vmem:[#allocation7 + $0x100] sm:$0xff]  ;;  %v535_v56 = vld [vmem:[#allocation7 + $0x110] sm:$0xff] }
  0x36   :  { %1261 = vmatpush1.bf16.msra.mxu0 %v1260_v35  ;;  %v537_v55 = vld [vmem:[#allocation7 + $0x120] sm:$0xff]  ;;  %v1394_v57 = vpack.c.bf16 %v540_v50, %v536_v49  ;;  %v539_v58 = vld [vmem:[#allocation7 + $0x130] sm:$0xff]  ;;  %v542_v59 = vld [vmem:[#allocation7 + $0x148] sm:$0xff] }
  0x37   :  { %1389 = vmatpush1.bf16.msra.mxu1 %v1388_v39  ;;  %1263 = vmatprep.subr.bf16.mxu0 %v1262_v40  ;;  %v546_v60 = vld [vmem:[#allocation7 + $0x168] sm:$0xff]  ;;  %v544_v61 = vld [vmem:[#allocation7 + $0x158] sm:$0xff]  ;;  %v1268_v63 = vpack.c.bf16 %v537_v55, %v533_v54  ;;  %v1396_v0 = vpack.c.bf16 %v539_v58, %v535_v56  ;;  %v541_v2 = vld [vmem:[#allocation7 + $0x140] sm:$0xff] }
  0x38   :  { %1391 = vmatprep.subr.bf16.mxu1 %v1390_v44  ;;  %v548_v62 = vld [vmem:[#allocation7 + $0x178] sm:$0xff]  ;;  %v1270_v1 = vpack.c.bf16 %v546_v60, %v542_v59  ;;  %v545_v3 = vld [vmem:[#allocation7 + $0x160] sm:$0xff]  ;;  %v543_v4 = vld [vmem:[#allocation7 + $0x150] sm:$0xff] }
  0x39   :  { %v1398_v5 = vpack.c.bf16 %v548_v62, %v544_v61  ;;  %v547_v6 = vld [vmem:[#allocation7 + $0x170] sm:$0xff]  ;;  %v550_v7 = vld [vmem:[#allocation7 + $0x188] sm:$0xff]  ;;  %v552_v9 = vld [vmem:[#allocation7 + $0x198] sm:$0xff]  ;;  %v1272_v11 = vpack.c.bf16 %v545_v3, %v541_v2 }
  0x3a   :  { %1265 = vmatpush1.bf16.msra.mxu0 %v1264_v51  ;;  %v554_v8 = vld [vmem:[#allocation7 + $0x1a8] sm:$0xff]  ;;  %v556_v10 = vld [vmem:[#allocation7 + $0x1b8] sm:$0xff]  ;;  %v1400_v12 = vpack.c.bf16 %v547_v6, %v543_v4  ;;  %v549_v14 = vld [vmem:[#allocation7 + $0x180] sm:$0xff] }
  0x3b   :  { %1393 = vmatpush1.bf16.msra.mxu1 %v1392_v52  ;;  %1267 = vmatprep.subr.bf16.mxu0 %v1266_v53  ;;  %v1274_v13 = vpack.c.bf16 %v554_v8, %v550_v7  ;;  %v553_v15 = vld [vmem:[#allocation7 + $0x1a0] sm:$0xff]  ;;  %v551_v16 = vld [vmem:[#allocation7 + $0x190] sm:$0xff]  ;;  %v1402_v17 = vpack.c.bf16 %v556_v10, %v552_v9  ;;  %v558_v19 = vld [vmem:[#allocation7 + $0x1c8] sm:$0xff] }
  0x3c   :  { %1395 = vmatprep.subr.bf16.mxu1 %v1394_v57  ;;  %v555_v18 = vld [vmem:[#allocation7 + $0x1b0] sm:$0xff]  ;;  %v562_v20 = vld [vmem:[#allocation7 + $0x1e8] sm:$0xff]  ;;  %v560_v21 = vld [vmem:[#allocation7 + $0x1d8] sm:$0xff]  ;;  %v1276_v23 = vpack.c.bf16 %v553_v15, %v549_v14 }
  0x3d   :  { %v564_v22 = vld [vmem:[#allocation7 + $0x1f8] sm:$0xff]  ;;  %v1404_v24 = vpack.c.bf16 %v555_v18, %v551_v16  ;;  %v1278_v25 = vpack.c.bf16 %v562_v20, %v558_v19  ;;  %v557_v26 = vld [vmem:[#allocation7 + $0x1c0] sm:$0xff]  ;;  %v559_v28 = vld [vmem:[#allocation7 + $0x1d0] sm:$0xff] }
  0x3e   :  { %1269 = vmatpush1.bf16.msra.mxu0 %v1268_v63  ;;  %v561_v27 = vld [vmem:[#allocation7 + $0x1e0] sm:$0xff]  ;;  %v1406_v29 = vpack.c.bf16 %v564_v22, %v560_v21  ;;  %v563_v30 = vld [vmem:[#allocation7 + $0x1f0] sm:$0xff]  ;;  %v566_v31 = vld [vmem:[#allocation7 + $0x208] sm:$0xff] }
  0x3f   :  { %1397 = vmatpush1.bf16.msra.mxu1 %v1396_v0  ;;  %1271 = vmatprep.subr.bf16.mxu0 %v1270_v1  ;;  %v570_v32 = vld [vmem:[#allocation7 + $0x228] sm:$0xff]  ;;  %v568_v33 = vld [vmem:[#allocation7 + $0x218] sm:$0xff]  ;;  %v1280_v35 = vpack.c.bf16 %v561_v27, %v557_v26  ;;  %v565_v36 = vld [vmem:[#allocation7 + $0x200] sm:$0xff]  ;;  %v1408_v37 = vpack.c.bf16 %v563_v30, %v559_v28 }
  0x40   :  { %1399 = vmatprep.subr.bf16.mxu1 %v1398_v5  ;;  %v572_v34 = vld [vmem:[#allocation7 + $0x238] sm:$0xff]  ;;  %v1282_v38 = vpack.c.bf16 %v570_v32, %v566_v31  ;;  %v569_v39 = vld [vmem:[#allocation7 + $0x220] sm:$0xff]  ;;  %v567_v40 = vld [vmem:[#allocation7 + $0x210] sm:$0xff] }
  0x41   :  { %v571_v41 = vld [vmem:[#allocation7 + $0x230] sm:$0xff]  ;;  %v1410_v42 = vpack.c.bf16 %v572_v34, %v568_v33  ;;  %v574_v43 = vld [vmem:[#allocation7 + $0x248] sm:$0xff]  ;;  %v576_v45 = vld [vmem:[#allocation7 + $0x258] sm:$0xff]  ;;  %v1284_v49 = vpack.c.bf16 %v569_v39, %v565_v36 }
  0x42   :  { %1273 = vmatpush1.bf16.msra.mxu0 %v1272_v11  ;;  %v578_v44 = vld [vmem:[#allocation7 + $0x268] sm:$0xff]  ;;  %v580_v46 = vld [vmem:[#allocation7 + $0x278] sm:$0xff]  ;;  %v1657_v47 = vld [vmem:[#allocation7 + $0x240] sm:$0xff]  ;;  %v1412_v54 = vpack.c.bf16 %v571_v41, %v567_v40 }
  0x43   :  { %1401 = vmatpush1.bf16.msra.mxu1 %v1400_v12  ;;  %1275 = vmatprep.subr.bf16.mxu0 %v1274_v13  ;;  %v1659_v48 = vld [vmem:[#allocation7 + $0x260] sm:$0xff]  ;;  %v1661_v50 = vld [vmem:[#allocation7 + $0x250] sm:$0xff]  ;;  %v1665_v52 = vld [vmem:[#allocation7 + $0x288] sm:$0xff]  ;;  %v1286_v55 = vpack.c.bf16 %v578_v44, %v574_v43  ;;  %v1414_v62 = vpack.c.bf16 %v580_v46, %v576_v45 }
  0x44   :  { %1403 = vmatprep.subr.bf16.mxu1 %v1402_v17  ;;  %v1663_v51 = vld [vmem:[#allocation7 + $0x270] sm:$0xff]  ;;  %v1667_v53 = vld [vmem:[#allocation7 + $0x2a8] sm:$0xff]  ;;  %v1669_v56 = vld [vmem:[#allocation7 + $0x298] sm:$0xff]  ;;  %v1288_v15 = vpack.c.bf16 %v1659_v48, %v1657_v47 }
  0x45   :  { %v1671_v57 = vld [vmem:[#allocation7 + $0x2b8] sm:$0xff]  ;;  %v1673_v58 = vld [vmem:[#allocation7 + $0x280] sm:$0xff]  ;;  %v1677_v60 = vld [vmem:[#allocation7 + $0x290] sm:$0xff]  ;;  %v1416_v22 = vpack.c.bf16 %v1663_v51, %v1661_v50 }
  0x46   :  { %1277 = vmatpush1.bf16.msra.mxu0 %v1276_v23  ;;  %v1675_v59 = vld [vmem:[#allocation7 + $0x2a0] sm:$0xff]  ;;  %v1679_v61 = vld [vmem:[#allocation7 + $0x2b0] sm:$0xff]  ;;  %v1681_v63 = vld [vmem:[#allocation7 + $0x2c8] sm:$0xff]  ;;  %v1290_v23 = vpack.c.bf16 %v1667_v53, %v1665_v52  ;;  %v1418_v28 = vpack.c.bf16 %v1671_v57, %v1669_v56 }
  0x47   :  { %1405 = vmatpush1.bf16.msra.mxu1 %v1404_v24  ;;  %1279 = vmatprep.subr.bf16.mxu0 %v1278_v25  ;;  %v1683_v0 = vld [vmem:[#allocation7 + $0x2e8] sm:$0xff]  ;;  %v1685_v1 = vld [vmem:[#allocation7 + $0x2d8] sm:$0xff]  ;;  %v1689_v3 = vld [vmem:[#allocation7 + $0x2c0] sm:$0xff]  ;;  %v1420_v30 = vpack.c.bf16 %v1679_v61, %v1677_v60 }
  0x48   :  { %1407 = vmatprep.subr.bf16.mxu1 %v1406_v29  ;;  %v1687_v2 = vld [vmem:[#allocation7 + $0x2f8] sm:$0xff]  ;;  %v1691_v4 = vld [vmem:[#allocation7 + $0x2e0] sm:$0xff]  ;;  %v1693_v5 = vld [vmem:[#allocation7 + $0x2d0] sm:$0xff]  ;;  %v1292_v29 = vpack.c.bf16 %v1675_v59, %v1673_v58  ;;  %v1294_v34 = vpack.c.bf16 %v1683_v0, %v1681_v63 }
  0x49   :  { %v1695_v6 = vld [vmem:[#allocation7 + $0x2f0] sm:$0xff]  ;;  %v1697_v7 = vld [vmem:[#allocation7 + $0x308] sm:$0xff]  ;;  %v1701_v9 = vld [vmem:[#allocation7 + $0x318] sm:$0xff] }
  0x4a   :  { %1281 = vmatpush1.bf16.msra.mxu0 %v1280_v35  ;;  %v1699_v8 = vld [vmem:[#allocation7 + $0x328] sm:$0xff]  ;;  %v1703_v10 = vld [vmem:[#allocation7 + $0x338] sm:$0xff]  ;;  %v1705_v11 = vld [vmem:[#allocation7 + $0x300] sm:$0xff]  ;;  %v1422_v35 = vpack.c.bf16 %v1687_v2, %v1685_v1 }
  0x4b   :  { %1409 = vmatpush1.bf16.msra.mxu1 %v1408_v37  ;;  %1283 = vmatprep.subr.bf16.mxu0 %v1282_v38  ;;  %v1707_v12 = vld [vmem:[#allocation7 + $0x320] sm:$0xff]  ;;  %v1709_v13 = vld [vmem:[#allocation7 + $0x310] sm:$0xff]  ;;  %v1715_v16 = vld [vmem:[#allocation7 + $0x348] sm:$0xff] }
  0x4c   :  { %1411 = vmatprep.subr.bf16.mxu1 %v1410_v42  ;;  %v1711_v14 = vld [vmem:[#allocation7 + $0x330] sm:$0xff]  ;;  %v1717_v17 = vld [vmem:[#allocation7 + $0x368] sm:$0xff]  ;;  %v1719_v18 = vld [vmem:[#allocation7 + $0x358] sm:$0xff] }
  0x4d   :  { %v1721_v19 = vld [vmem:[#allocation7 + $0x378] sm:$0xff]  ;;  %v1723_v20 = vld [vmem:[#allocation7 + $0x340] sm:$0xff]  ;;  %v1731_v24 = vld [vmem:[#allocation7 + $0x350] sm:$0xff] }
  0x4e   :  { %1285 = vmatpush1.bf16.msra.mxu0 %v1284_v49  ;;  %v1725_v21 = vld [vmem:[#allocation7 + $0x360] sm:$0xff]  ;;  %v1733_v25 = vld [vmem:[#allocation7 + $0x370] sm:$0xff]  ;;  %v1735_v26 = vld [vmem:[#allocation7 + $0x388] sm:$0xff] }
  0x4f   :  { %1413 = vmatpush1.bf16.msra.mxu1 %v1412_v54  ;;  %1287 = vmatprep.subr.bf16.mxu0 %v1286_v55  ;;  %v1737_v27 = vld [vmem:[#allocation7 + $0x3a8] sm:$0xff]  ;;  %v1745_v31 = vld [vmem:[#allocation7 + $0x398] sm:$0xff]  ;;  %v1749_v33 = vld [vmem:[#allocation7 + $0x380] sm:$0xff] }
  0x50   :  { %1415 = vmatprep.subr.bf16.mxu1 %v1414_v62  ;;  %v1747_v32 = vld [vmem:[#allocation7 + $0x3b8] sm:$0xff]  ;;  %v1759_v38 = vld [vmem:[#allocation7 + $0x3a0] sm:$0xff]  ;;  %v1761_v39 = vld [vmem:[#allocation7 + $0x390] sm:$0xff] }
  0x51   :  { %v1763_v40 = vld [vmem:[#allocation7 + $0x3b0] sm:$0xff]  ;;  %v1773_v45 = vld [vmem:[#allocation7 + $0x3c8] sm:$0xff]  ;;  %v1777_v47 = vld [vmem:[#allocation7 + $0x3d8] sm:$0xff] }
  0x52   :  { %1289 = vmatpush1.bf16.msra.mxu0 %v1288_v15  ;;  %v1775_v46 = vld [vmem:[#allocation7 + $0x3e8] sm:$0xff]  ;;  %v1785_v51 = vld [vmem:[#allocation7 + $0x3f8] sm:$0xff]  ;;  %v1787_v52 = vld [vmem:[#allocation7 + $0x3c0] sm:$0xff] }
  0x53   :  { %1417 = vmatpush1.bf16.msra.mxu1 %v1416_v22  ;;  %1291 = vmatprep.subr.bf16.mxu0 %v1290_v23  ;;  %v1789_v53 = vld [vmem:[#allocation7 + $0x3e0] sm:$0xff]  ;;  %v1799_v58 = vld [vmem:[#allocation7 + $0x3d0] sm:$0xff]  ;;  %v60_v60 = vld [vmem:[#allocation4 + $0x8] sm:$0xff] }
  0x54   :  { %1419 = vmatprep.subr.bf16.mxu1 %v1418_v28  ;;  %2421 = vst [vmem:[#allocation13_spill] sm:$0xff] %v1799_v58  ;;  %v1801_v59 = vld [vmem:[#allocation7 + $0x3f0] sm:$0xff]  ;;  %v64_v0 = vld [vmem:[#allocation4 + $0x28] sm:$0xff]  ;;  %v128_v15 = vmax.f32 %v60_v60, 0.0 }
  0x55   :  { %v68_v1 = vld [vmem:[#allocation4 + $0x48] sm:$0xff]  ;;  %v132_v56 = vmax.f32 %v64_v0, 0.0 }
  0x56   :  { %v72_v2 = vld [vmem:[#allocation4 + $0x68] sm:$0xff]  ;;  %1293 = vmatpush1.bf16.msra.mxu0 %v1292_v29  ;;  %v136_v55 = vmax.f32 %v68_v1, 0.0 }
  0x57   :  { %v76_v23 = vld [vmem:[#allocation4 + $0x88] sm:$0xff]  ;;  %v140_v61 = vmax.f32 %v72_v2, 0.0  ;;  %1421 = vmatpush1.bf16.msra.mxu1 %v1420_v30  ;;  %1295 = vmatprep.subr.bf16.mxu0 %v1294_v34  ;;  %v198_v1 = vadd.f32 %v132_v56, %v128_v15 }
  0x58   :  { %v80_v28 = vld [vmem:[#allocation4 + $0xa8] sm:$0xff]  ;;  %v144_v49 = vmax.f32 %v76_v23, 0.0  ;;  %1423 = vmatprep.subr.bf16.mxu1 %v1422_v35  ;;  %v2422_v23 = vpack.c.bf16 %v1691_v4, %v1689_v3  ;;  %v2425_v3 = vpack.c.bf16 %v1703_v10, %v1701_v9  ;;  %v2427_v9 = vpack.c.bf16 %v1711_v14, %v1709_v13 }
  0x59   :  { %v84_v57 = vld [vmem:[#allocation4 + $0xc8] sm:$0xff]  ;;  %v148_v60 = vmax.f32 %v80_v28, 0.0  ;;  %v226_v36 = vadd.f32 %v140_v61, %v136_v55  ;;  %v199_v58 = vrot.slane %v198_v1, 4  ;;  %v2428_v10 = vpack.c.bf16 %v1717_v17, %v1715_v16 }
  0x5a   :  { %v88_v63 = vld [vmem:[#allocation4 + $0xe8] sm:$0xff]  ;;  %v152_v29 = vmax.f32 %v84_v57, 0.0  ;;  %1297 = vmatpush1.bf16.msra.mxu0 %v2422_v23  ;;  %v2430_v16 = vpack.c.bf16 %v1725_v21, %v1723_v20 }
  0x5b   :  { %v92_v54 = vld [vmem:[#allocation4 + $0x108] sm:$0xff]  ;;  %v156_v43 = vmax.f32 %v88_v63, 0.0  ;;  %v254_v56 = vadd.f32 %v148_v60, %v144_v49  ;;  %v200_v4 = vadd.f32 %v199_v58, %v198_v1 }
  0x5c   :  { %v96_v50 = vld [vmem:[#allocation4 + $0x128] sm:$0xff]  ;;  %v160_v42 = vmax.f32 %v92_v54, 0.0  ;;  %v2423_v54 = vpack.c.bf16 %v1695_v6, %v1693_v5 }
  0x5d   :  { %v100_v48 = vld [vmem:[#allocation4 + $0x148] sm:$0xff]  ;;  %v164_v0 = vmax.f32 %v96_v50, 0.0  ;;  %v2424_v50 = vpack.c.bf16 %v1699_v8, %v1697_v7  ;;  %v2426_v7 = vpack.c.bf16 %v1707_v12, %v1705_v11  ;;  %v201_v8 = vrot.slane %v200_v4, 2 }
  0x5e   :  { %v104_v22 = vld [vmem:[#allocation4 + $0x168] sm:$0xff]  ;;  %v168_v41 = vmax.f32 %v100_v48, 0.0  ;;  %1425 = vmatpush1.bf16.msra.mxu1 %v2423_v54  ;;  %v227_v48 = vrot.slane %v226_v36, 4  ;;  %v2429_v11 = vpack.c.bf16 %v1721_v19, %v1719_v18  ;;  %v2431_v18 = vpack.c.bf16 %v1733_v25, %v1731_v24  ;;  %v1849_v25 = vld [vmem:[#allocation4] sm:$0xff] }
  0x5f   :  { %v108_v44 = vld [vmem:[#allocation4 + $0x188] sm:$0xff]  ;;  %v172_v37 = vmax.f32 %v104_v22, 0.0  ;;  %1299 = vmatprep.subr.bf16.mxu0 %v2424_v50  ;;  %v310_v55 = vadd.f32 %v164_v0, %v160_v42  ;;  %1427 = vmatprep.subr.bf16.mxu1 %v2425_v3  ;;  %v202_v12 = vadd.f32 %v201_v8, %v200_v4  ;;  %v2432_v19 = vpack.c.bf16 %v1737_v27, %v1735_v26  ;;  %v632_v4 = vld [vmem:[#allocation7 + $0x418] sm:$0xff] }
  0x60   :  { %v112_v2 = vld [vmem:[#allocation4 + $0x1a8] sm:$0xff]  ;;  %v176_v62 = vmax.f32 %v108_v44, 0.0  ;;  %v282_v44 = vadd.f32 %v156_v43, %v152_v29  ;;  %v228_v22 = vadd.f32 %v227_v48, %v226_v36  ;;  %1301 = vmatpush1.bf16.msra.mxu0 %v2426_v7  ;;  %v2433_v50 = vpack.c.bf16 %v1747_v32, %v1745_v31  ;;  %v636_v32 = vld [vmem:[#allocation7 + $0x438] sm:$0xff] }
  0x61   :  { %v116_v30 = vld [vmem:[#allocation4 + $0x1c8] sm:$0xff]  ;;  %v180_v57 = vmax.f32 %v112_v2, 0.0  ;;  %v338_v61 = vadd.f32 %v172_v37, %v168_v41  ;;  %v255_v2 = vrot.slane %v254_v56, 4  ;;  %v311_v6 = vrot.slane %v310_v55, 4  ;;  %1303 = vmatprep.subr.bf16.mxu0 %v2428_v10 }
  0x62   :  { %v120_v34 = vld [vmem:[#allocation4 + $0x1e8] sm:$0xff]  ;;  %v184_v35 = vmax.f32 %v116_v30, 0.0  ;;  %v283_v5 = vrot.slane %v282_v44, 4  ;;  %1429 = vmatpush1.bf16.msra.mxu1 %v2427_v9  ;;  %v229_v36 = vrot.slane %v228_v22, 2  ;;  %v203_v17 = vrot.slane %v202_v12, 1 }
  0x63   :  { %v188_v28 = vmax.f32 %v120_v34, 0.0  ;;  %v366_v63 = vadd.f32 %v180_v57, %v176_v62  ;;  %v339_v43 = vrot.slane %v338_v61, 4  ;;  %v256_v37 = vadd.f32 %v255_v2, %v254_v56  ;;  %1431 = vmatprep.subr.bf16.mxu1 %v2429_v11  ;;  %v630_v20 = vld [vmem:[#allocation7 + $0x408] sm:$0xff]  ;;  %v63_v2 = vld [vmem:[#allocation4 + $0x20] sm:$0xff] }
  0x64   :  { %v284_v41 = vadd.f32 %v283_v5, %v282_v44  ;;  %v312_v58 = vadd.f32 %v311_v6, %v310_v55  ;;  %v230_v13 = vadd.f32 %v229_v36, %v228_v22  ;;  %1305 = vmatpush1.bf16.msra.mxu0 %v2430_v16  ;;  %v634_v21 = vld [vmem:[#allocation7 + $0x428] sm:$0xff]  ;;  %v204_v48 = vadd.f32 %v203_v17, %v202_v12  ;;  %v67_v5 = vld [vmem:[#allocation4 + $0x40] sm:$0xff] }
  0x65   :  { %v394_v15 = vadd.f32 %v188_v28, %v184_v35  ;;  %v367_v42 = vrot.slane %v366_v63, 4  ;;  %v340_v62 = vadd.f32 %v339_v43, %v338_v61  ;;  %v257_v14 = vrot.slane %v256_v37, 2  ;;  %1307 = vmatprep.subr.bf16.mxu0 %v2432_v19  ;;  %v95_v12 = vld [vmem:[#allocation4 + $0x120] sm:$0xff] }
  0x66   :  { %v285_v0 = vrot.slane %v284_v41, 2  ;;  %v313_v1 = vrot.slane %v312_v58, 2  ;;  %1433 = vmatpush1.bf16.msra.mxu1 %v2431_v18  ;;  %v231_v57 = vrot.slane %v230_v13, 1  ;;  %v2434_v61 = vpack.c.bf16 %v1759_v38, %v1749_v33  ;;  %v71_v33 = vld [vmem:[#allocation4 + $0x60] sm:$0xff] }
  0x67   :  { %v395_v49 = vrot.slane %v394_v15, 4  ;;  %v368_v60 = vadd.f32 %v367_v42, %v366_v63  ;;  %v341_v30 = vrot.slane %v340_v62, 2  ;;  %v258_v35 = vadd.f32 %v257_v14, %v256_v37  ;;  %1435 = vmatprep.subr.bf16.mxu1 %v2433_v50  ;;  %v75_v38 = vld [vmem:[#allocation4 + $0x80] sm:$0xff] }
  0x68   :  { %v286_v28 = vadd.f32 %v285_v0, %v284_v41  ;;  %v314_v54 = vadd.f32 %v313_v1, %v312_v58  ;;  %v232_v55 = vadd.f32 %v231_v57, %v230_v13  ;;  %1309 = vmatpush1.bf16.msra.mxu0 %v2434_v61  ;;  %v1314_v31 = vpack.c.bf16 %v634_v21, %v630_v20  ;;  %v83_v41 = vld [vmem:[#allocation4 + $0xc0] sm:$0xff] }
  0x69   :  { %v396_v29 = vadd.f32 %v395_v49, %v394_v15  ;;  %v369_v34 = vrot.slane %v368_v60, 2  ;;  %v342_v56 = vadd.f32 %v341_v30, %v340_v62  ;;  %v259_v26 = vrot.slane %v258_v35, 1  ;;  %v79_v49 = vld [vmem:[#allocation4 + $0xa0] sm:$0xff] }
  0x6a   :  { %v287_v27 = vrot.slane %v286_v28, 1  ;;  %v315_v3 = vrot.slane %v314_v54, 1  ;;  %v2435_v6 = vpack.c.bf16 %v1763_v40, %v1761_v39  ;;  %v2436_v7 = vpack.c.bf16 %v1775_v46, %v1773_v45  ;;  %v87_v45 = vld [vmem:[#allocation4 + $0xe0] sm:$0xff] }
  0x6b   :  { %v397_v23 = vrot.slane %v396_v29, 2  ;;  %v370_v44 = vadd.f32 %v369_v34, %v368_v60  ;;  %v343_v63 = vrot.slane %v342_v56, 1  ;;  %v260_v8 = vadd.f32 %v259_v26, %v258_v35  ;;  %v91_v46 = vld [vmem:[#allocation4 + $0x100] sm:$0xff] }
  0x6c   :  { %1437 = vmatpush1.bf16.msra.mxu1 %v2435_v6  ;;  %1311 = vmatprep.subr.bf16.mxu0 %v2436_v7  ;;  %v288_v43 = vadd.f32 %v287_v27, %v286_v28  ;;  %v316_v42 = vadd.f32 %v315_v3, %v314_v54  ;;  %v127_v9 = vmax.f32 %v1849_v25, 0.0  ;;  %v2437_v10 = vpack.c.bf16 %v1785_v51, %v1777_v47  ;;  %v99_v62 = vld [vmem:[#allocation4 + $0x140] sm:$0xff] }
  0x6d   :  { %v398_v24 = vadd.f32 %v397_v23, %v396_v29  ;;  %v371_v15 = vrot.slane %v370_v44, 1  ;;  %v344_v36 = vadd.f32 %v343_v63, %v342_v56  ;;  %v461_v40 = vsel %vm447_vm0, %v232_v55, %v204_v48  ;;  %v103_v60 = vld [vmem:[#allocation4 + $0x160] sm:$0xff] }
  0x6e   :  { %1439 = vmatprep.subr.bf16.mxu1 %v2437_v10  ;;  %v462_v58 = vsel %vm449_vm1, %v260_v8, %v461_v40  ;;  %v1442_v11 = vpack.c.bf16 %v636_v32, %v632_v4  ;;  %v131_v29 = vmax.f32 %v63_v2, 0.0  ;;  %v135_v13 = vmax.f32 %v67_v5, 0.0  ;;  %v107_v14 = vld [vmem:[#allocation4 + $0x180] sm:$0xff] }
  0x6f   :  { %v399_v22 = vrot.slane %v398_v24, 1  ;;  %v372_v37 = vadd.f32 %v371_v15, %v370_v44  ;;  %v2438_v47 = vpack.c.bf16 %v1789_v53, %v1787_v52  ;;  %v463_v51 = vsel %vm451_vm2, %v288_v43, %v462_v58  ;;  %v111_v0 = vld [vmem:[#allocation4 + $0x1a0] sm:$0xff] }
  0x70   :  { %v115_v1 = vld [vmem:[#allocation4 + $0x1c0] sm:$0xff]  ;;  %v139_v16 = vmax.f32 %v71_v33, 0.0  ;;  %v143_v17 = vmax.f32 %v75_v38, 0.0  ;;  %v147_v30 = vmax.f32 %v79_v49, 0.0  ;;  %v464_v18 = vsel %vm453_vm3, %v316_v42, %v463_v51 }
  0x71   :  { %v400_v39 = vadd.f32 %v399_v22, %v398_v24  ;;  %1313 = vmatpush1.bf16.msra.mxu0 %v2438_v47  ;;  %v2439_v34 = vld [vmem:[#allocation13_spill] sm:$0xff]  ;;  %v151_v57 = vmax.f32 %v83_v41, 0.0  ;;  %v155_v35 = vmax.f32 %v87_v45, 0.0  ;;  %v159_v52 = vmax.f32 %v91_v46, 0.0 }
  0x72   :  { %v2440_v23 = vpack.c.bf16 %v1801_v59, %v2439_v34  ;;  %1315 = vmatprep.subr.bf16.mxu0 %v1314_v31  ;;  %v119_v19 = vld [vmem:[#allocation4 + $0x1e0] sm:$0xff]  ;;  %v465_v53 = vsel %vm455_vm4, %v344_v36, %v464_v18  ;;  %v163_v28 = vmax.f32 %v95_v12, 0.0  ;;  %v167_v54 = vmax.f32 %v99_v62, 0.0 }
  0x73   :  { %v171_v20 = vmax.f32 %v103_v60, 0.0  ;;  %v466_v21 = vsel %vm457_vm5, %v372_v37, %v465_v53  ;;  %v175_v50 = vmax.f32 %v107_v14, 0.0  ;;  %v179_v48 = vmax.f32 %v111_v0, 0.0  ;;  %v1879_v53 = vld [vmem:[#allocation7 + $0x420] sm:$0xff] }
  0x74   :  { %1441 = vmatpush1.bf16.msra.mxu1 %v2440_v23  ;;  %v183_v56 = vmax.f32 %v115_v1, 0.0  ;;  %v467_v59 = vsel %vm459_vm6, %v400_v39, %v466_v21  ;;  %v187_v44 = vmax.f32 %v119_v19, 0.0  ;;  %v191_v24 = vadd.f32 %v131_v29, %v127_v9  ;;  %v1887_v21 = vld [vmem:[#allocation7 + $0x468] sm:$0xff] }
  0x75   :  { %1443 = vmatprep.subr.bf16.mxu1 %v1442_v11  ;;  %v219_v25 = vadd.f32 %v139_v16, %v135_v13  ;;  %843 = vmatprep.mubr.f32.mxu0 %v467_v59  ;;  %v247_v55 = vadd.f32 %v147_v30, %v143_v17  ;;  %v275_v26 = vadd.f32 %v155_v35, %v151_v57 }
  0x76   :  { %985 = vmatprep.mubr.f32.mxu1 %v467_v59  ;;  %v303_v27 = vadd.f32 %v163_v28, %v159_v52  ;;  %v192_v3 = vrot.slane %v191_v24, 4  ;;  %v331_v61 = vadd.f32 %v171_v20, %v167_v54  ;;  %v359_v63 = vadd.f32 %v179_v48, %v175_v50  ;;  %v1877_v52 = vld [vmem:[#allocation7 + $0x400] sm:$0xff]  ;;  %v1881_v28 = vld [vmem:[#allocation7 + $0x410] sm:$0xff]  ;;  %v1885_v20 = vld [vmem:[#allocation7 + $0x448] sm:$0xff] }
  0x77   :  { %v220_v4 = vrot.slane %v219_v25, 4  ;;  %v248_v15 = vrot.slane %v247_v55, 4  ;;  %v276_v22 = vrot.slane %v275_v26, 4  ;;  %v387_v32 = vadd.f32 %v187_v44, %v183_v56  ;;  %v1883_v54 = vld [vmem:[#allocation7 + $0x430] sm:$0xff]  ;;  %v1890_v56 = vld [vmem:[#allocation7 + $0x458] sm:$0xff]  ;;  %v1894_v44 = vld [vmem:[#allocation7 + $0x440] sm:$0xff] }
  0x78   :  { %v304_v31 = vrot.slane %v303_v27, 4  ;;  %v193_v2 = vadd.f32 %v192_v3, %v191_v24  ;;  %v332_v6 = vrot.slane %v331_v61, 4  ;;  %v360_v7 = vrot.slane %v359_v63, 4  ;;  %v1892_v59 = vld [vmem:[#allocation7 + $0x478] sm:$0xff]  ;;  %v1896_v24 = vld [vmem:[#allocation7 + $0x460] sm:$0xff]  ;;  %v1903_v3 = vld [vmem:[#allocation7 + $0x488] sm:$0xff] }
  0x79   :  { %v221_v5 = vadd.f32 %v220_v4, %v219_v25  ;;  %v249_v8 = vadd.f32 %v248_v15, %v247_v55  ;;  %v277_v43 = vadd.f32 %v276_v22, %v275_v26  ;;  %v388_v33 = vrot.slane %v387_v32, 4  ;;  %v1898_v25 = vld [vmem:[#allocation7 + $0x450] sm:$0xff]  ;;  %v1905_v4 = vld [vmem:[#allocation7 + $0x4a8] sm:$0xff]  ;;  %v1911_v15 = vld [vmem:[#allocation7 + $0x480] sm:$0xff] }
  0x7a   :  { %v305_v42 = vadd.f32 %v304_v31, %v303_v27  ;;  %v194_v38 = vrot.slane %v193_v2, 2  ;;  %v333_v9 = vadd.f32 %v332_v6, %v331_v61  ;;  %v361_v10 = vadd.f32 %v360_v7, %v359_v63  ;;  %v1900_v55 = vld [vmem:[#allocation7 + $0x470] sm:$0xff]  ;;  %v1907_v61 = vld [vmem:[#allocation7 + $0x498] sm:$0xff]  ;;  %v1913_v22 = vld [vmem:[#allocation7 + $0x4a0] sm:$0xff] }
  0x7b   :  { %v222_v49 = vrot.slane %v221_v5, 2  ;;  %v250_v36 = vrot.slane %v249_v8, 2  ;;  %v278_v37 = vrot.slane %v277_v43, 2  ;;  %v389_v40 = vadd.f32 %v388_v33, %v387_v32  ;;  %v1909_v63 = vld [vmem:[#allocation7 + $0x4b8] sm:$0xff]  ;;  %v1920_v6 = vld [vmem:[#allocation7 + $0x4c8] sm:$0xff]  ;;  %v1929_v33 = vld [vmem:[#allocation7 + $0x4c0] sm:$0xff] }
  0x7c   :  { %v306_v39 = vrot.slane %v305_v42, 2  ;;  %v195_v41 = vadd.f32 %v194_v38, %v193_v2  ;;  %v334_v46 = vrot.slane %v333_v9, 2  ;;  %v362_v58 = vrot.slane %v361_v10, 2  ;;  %v1916_v2 = vld [vmem:[#allocation7 + $0x490] sm:$0xff]  ;;  %v1922_v7 = vld [vmem:[#allocation7 + $0x4e8] sm:$0xff]  ;;  %v1931_v38 = vld [vmem:[#allocation7 + $0x4e0] sm:$0xff] }
  0x7d   :  { %v223_v45 = vadd.f32 %v222_v49, %v221_v5  ;;  %v251_v11 = vadd.f32 %v250_v36, %v249_v8  ;;  %v279_v12 = vadd.f32 %v278_v37, %v277_v43  ;;  %v390_v60 = vrot.slane %v389_v40, 2  ;;  %v1918_v5 = vld [vmem:[#allocation7 + $0x4b0] sm:$0xff]  ;;  %v1924_v8 = vld [vmem:[#allocation7 + $0x4d8] sm:$0xff]  ;;  %v1939_v36 = vld [vmem:[#allocation7 + $0x528] sm:$0xff] }
  0x7e   :  { %v307_v62 = vadd.f32 %v306_v39, %v305_v42  ;;  %v196_v29 = vrot.slane %v195_v41, 1  ;;  %v335_v47 = vadd.f32 %v334_v46, %v333_v9  ;;  %v363_v51 = vadd.f32 %v362_v58, %v361_v10  ;;  %v1926_v43 = vld [vmem:[#allocation7 + $0x4f8] sm:$0xff]  ;;  %v1933_v49 = vld [vmem:[#allocation7 + $0x4d0] sm:$0xff]  ;;  %v1937_v10 = vld [vmem:[#allocation7 + $0x508] sm:$0xff]  ;;  %2443 = vst [vmem:[#allocation15_spill] sm:$0xff] %v1939_v36 }
  0x7f   :  { %v224_v13 = vrot.slane %v223_v45, 1  ;;  %v252_v14 = vrot.slane %v251_v11, 1  ;;  %v280_v0 = vrot.slane %v279_v12, 1  ;;  %v391_v16 = vadd.f32 %v390_v60, %v389_v40  ;;  %2441 = vst [vmem:[#allocation13_spill] sm:$0xff] %v1933_v49  ;;  %v1935_v9 = vld [vmem:[#allocation7 + $0x4f0] sm:$0xff]  ;;  %2442 = vst [vmem:[#allocation14_spill] sm:$0xff] %v1937_v10 }
  0x80   :  { %v308_v1 = vrot.slane %v307_v62, 1  ;;  %v197_v17 = vadd.f32 %v196_v29, %v195_v41  ;;  %v336_v34 = vrot.slane %v335_v47, 1  ;;  %v364_v23 = vrot.slane %v363_v51, 1  ;;  %v1950_v46 = vld [vmem:[#allocation7 + $0x538] sm:$0xff]  ;;  %v1952_v58 = vld [vmem:[#allocation7 + $0x500] sm:$0xff]  ;;  %v2054_v10 = vld [vmem:[#allocation7 + $0x630] sm:$0xff] }
  0x81   :  { %v225_v30 = vadd.f32 %v224_v13, %v223_v45  ;;  %v253_v18 = vadd.f32 %v252_v14, %v251_v11  ;;  %v281_v19 = vadd.f32 %v280_v0, %v279_v12  ;;  %v392_v35 = vrot.slane %v391_v16, 1  ;;  %v1948_v45 = vld [vmem:[#allocation7 + $0x518] sm:$0xff]  ;;  %2445 = vst [vmem:[#allocation17_spill] sm:$0xff] %v1950_v46  ;;  %2446 = vst [vmem:[#allocation18_spill] sm:$0xff] %v1952_v58  ;;  %v1954_v11 = vld [vmem:[#allocation7 + $0x520] sm:$0xff] }
  0x82   :  { %v309_v57 = vadd.f32 %v308_v1, %v307_v62  ;;  %v337_v50 = vadd.f32 %v336_v34, %v335_v47  ;;  %v365_v26 = vadd.f32 %v364_v23, %v363_v51  ;;  %v1316_v39 = vpack.c.bf16 %v1879_v53, %v1877_v52  ;;  %2444 = vst [vmem:[#allocation16_spill] sm:$0xff] %v1948_v45  ;;  %v1956_v12 = vld [vmem:[#allocation7 + $0x510] sm:$0xff]  ;;  %v1967_v51 = vld [vmem:[#allocation7 + $0x548] sm:$0xff]  ;;  %v1971_v0 = vld [vmem:[#allocation7 + $0x558] sm:$0xff] }
  0x83   :  { %v448_v48 = vsel %vm447_vm0, %v225_v30, %v197_v17  ;;  %v393_v31 = vadd.f32 %v392_v35, %v391_v16  ;;  %v1444_v40 = vpack.c.bf16 %v1883_v54, %v1881_v28  ;;  %v1318_v41 = vpack.c.bf16 %v1887_v21, %v1885_v20  ;;  %2447 = vst [vmem:[#allocation19_spill] sm:$0xff] %v1954_v11  ;;  %v1958_v62 = vld [vmem:[#allocation7 + $0x530] sm:$0xff]  ;;  %v1969_v14 = vld [vmem:[#allocation7 + $0x568] sm:$0xff]  ;;  %v1973_v1 = vld [vmem:[#allocation7 + $0x578] sm:$0xff] }
  0x84   :  { %v450_v27 = vsel %vm449_vm1, %v253_v18, %v448_v48  ;;  %2448 = vst [vmem:[#allocation20_spill] sm:$0xff] %v1956_v12  ;;  %2449 = vst [vmem:[#allocation21_spill] sm:$0xff] %v1958_v62  ;;  %v1446_v29 = vpack.c.bf16 %v1892_v59, %v1890_v56  ;;  %v1975_v16 = vld [vmem:[#allocation7 + $0x540] sm:$0xff]  ;;  %v1979_v30 = vld [vmem:[#allocation7 + $0x550] sm:$0xff]  ;;  %v2474_v62 = vpack.c.bf16 %v1896_v24, %v1894_v44 }
  0x85   :  { %v452_v32 = vsel %vm451_vm2, %v281_v19, %v450_v27  ;;  %2450 = vst [vmem:[#allocation22_spill] sm:$0xff] %v1967_v51  ;;  %2451 = vst [vmem:[#allocation23_spill] sm:$0xff] %v1969_v14  ;;  %v1977_v17 = vld [vmem:[#allocation7 + $0x560] sm:$0xff]  ;;  %v1981_v34 = vld [vmem:[#allocation7 + $0x570] sm:$0xff] }
  0x86   :  { %v454_v42 = vsel %vm453_vm3, %v309_v57, %v452_v32  ;;  %2452 = vst [vmem:[#allocation24_spill] sm:$0xff] %v1971_v0  ;;  %2453 = vst [vmem:[#allocation25_spill] sm:$0xff] %v1973_v1  ;;  %v1990_v35 = vld [vmem:[#allocation7 + $0x588] sm:$0xff]  ;;  %v1994_v53 = vld [vmem:[#allocation7 + $0x598] sm:$0xff] }
  0x87   :  { %v456_v37 = vsel %vm455_vm4, %v337_v50, %v454_v42  ;;  %2454 = vst [vmem:[#allocation26_spill] sm:$0xff] %v1975_v16  ;;  %2455 = vst [vmem:[#allocation27_spill] sm:$0xff] %v1977_v17  ;;  %v1992_v52 = vld [vmem:[#allocation7 + $0x5a8] sm:$0xff]  ;;  %v1996_v28 = vld [vmem:[#allocation7 + $0x5b8] sm:$0xff] }
  0x88   :  { %v458_v60 = vsel %vm457_vm5, %v365_v26, %v456_v37  ;;  %2456 = vst [vmem:[#allocation28_spill] sm:$0xff] %v1979_v30  ;;  %2457 = vst [vmem:[#allocation29_spill] sm:$0xff] %v1981_v34  ;;  %v1998_v54 = vld [vmem:[#allocation7 + $0x580] sm:$0xff]  ;;  %v2002_v21 = vld [vmem:[#allocation7 + $0x590] sm:$0xff]  ;;  %v2475_v30 = vpack.c.bf16 %v1900_v55, %v1898_v25  ;;  %v2479_v55 = vpack.c.bf16 %v1905_v4, %v1903_v3 }
  0x89   :  { %v460_v23 = vsel %vm459_vm6, %v393_v31, %v458_v60  ;;  %2458 = vst [vmem:[#allocation30_spill] sm:$0xff] %v1994_v53  ;;  %2459 = vst [vmem:[#allocation31_spill] sm:$0xff] %v1998_v54  ;;  %v2000_v20 = vld [vmem:[#allocation7 + $0x5a0] sm:$0xff]  ;;  %v2004_v50 = vld [vmem:[#allocation7 + $0x5b0] sm:$0xff] }
  0x8a   :  { %2460 = vst [vmem:[#allocation32_spill] sm:$0xff] %v2000_v20  ;;  %2461 = vst [vmem:[#allocation33_spill] sm:$0xff] %v2002_v21  ;;  %844 = vmatmul.mubr.f32.vlgmr.msra.gmra.mrb[0].mxu0 %v460_v23  ;;  %986 = vmatmul.mubr.f32.vlgmr.msra.gmra.mrb[0].mxu1 %v460_v23  ;;  %v2012_v26 = vld [vmem:[#allocation7 + $0x5c8] sm:$0xff]  ;;  %v2016_v31 = vld [vmem:[#allocation7 + $0x5d8] sm:$0xff] }
  0x8b   :  { %2462 = vst [vmem:[#allocation34_spill] sm:$0xff] %v2004_v50  ;;  %v2014_v27 = vld [vmem:[#allocation7 + $0x5e8] sm:$0xff]  ;;  %v2018_v32 = vld [vmem:[#allocation7 + $0x5f8] sm:$0xff]  ;;  %v2020_v42 = vld [vmem:[#allocation7 + $0x5c0] sm:$0xff]  ;;  %1317 = vmatpush1.bf16.msra.mxu0 %v1316_v39  ;;  %1445 = vmatpush1.bf16.msra.mxu1 %v1444_v40 }
  0x8c   :  { %2463 = vst [vmem:[#allocation35_spill] sm:$0xff] %v2020_v42  ;;  %v2022_v37 = vld [vmem:[#allocation7 + $0x5e0] sm:$0xff]  ;;  %v2030_v56 = vld [vmem:[#allocation7 + $0x5d0] sm:$0xff]  ;;  %v2034_v57 = vld [vmem:[#allocation7 + $0x608] sm:$0xff]  ;;  %1319 = vmatprep.subr.bf16.mxu0 %v1318_v41  ;;  %1447 = vmatprep.subr.bf16.mxu1 %v1446_v29 }
  0x8d   :  { %2464 = vst [vmem:[#allocation36_spill] sm:$0xff] %v2022_v37  ;;  %v2032_v48 = vld [vmem:[#allocation7 + $0x5f0] sm:$0xff]  ;;  %2465 = vst [vmem:[#allocation37_spill] sm:$0xff] %v2034_v57  ;;  %v2036_v19 = vld [vmem:[#allocation7 + $0x628] sm:$0xff] }
  0x8e   :  { %v2038_v18 = vld [vmem:[#allocation7 + $0x618] sm:$0xff]  ;;  %v2048_v60 = vld [vmem:[#allocation7 + $0x600] sm:$0xff]  ;;  %v2052_v13 = vld [vmem:[#allocation7 + $0x610] sm:$0xff] }
  0x8f   :  { %2466 = vst [vmem:[#allocation38_spill] sm:$0xff] %v2038_v18  ;;  %v2040_v39 = vld [vmem:[#allocation7 + $0x638] sm:$0xff]  ;;  %v2050_v47 = vld [vmem:[#allocation7 + $0x620] sm:$0xff]  ;;  %v2056_v36 = vld [vmem:[#allocation7 + $0x648] sm:$0xff]  ;;  %1321 = vmatpush1.bf16.msra.mxu0 %v2474_v62  ;;  %1449 = vmatpush1.bf16.msra.mxu1 %v2475_v30  ;;  %v2480_v62 = vpack.c.bf16 %v1909_v63, %v1907_v61 }
  0x90   :  { %2467 = vst [vmem:[#allocation39_spill] sm:$0xff] %v2040_v39  ;;  %2468 = vst [vmem:[#allocation40_spill] sm:$0xff] %v2056_v36  ;;  %v2058_v41 = vld [vmem:[#allocation7 + $0x668] sm:$0xff]  ;;  %v2060_v29 = vld [vmem:[#allocation7 + $0x658] sm:$0xff]  ;;  %1323 = vmatprep.subr.bf16.mxu0 %v2479_v55 }
  0x91   :  { %2469 = vst [vmem:[#allocation41_spill] sm:$0xff] %v2058_v41  ;;  %2470 = vst [vmem:[#allocation42_spill] sm:$0xff] %v2060_v29  ;;  %v2062_v40 = vld [vmem:[#allocation7 + $0x678] sm:$0xff]  ;;  %v2072_v58 = vld [vmem:[#allocation7 + $0x640] sm:$0xff]  ;;  %1451 = vmatprep.subr.bf16.mxu1 %v2480_v62  ;;  %v2492_v41 = vpack.c.bf16 %v1918_v5, %v1916_v2 }
  0x92   :  { %2471 = vst [vmem:[#allocation43_spill] sm:$0xff] %v2062_v40  ;;  %v2074_v11 = vld [vmem:[#allocation7 + $0x660] sm:$0xff]  ;;  %v2076_v45 = vld [vmem:[#allocation7 + $0x650] sm:$0xff]  ;;  %v2080_v49 = vld [vmem:[#allocation7 + $0x688] sm:$0xff]  ;;  %v2491_v40 = vpack.c.bf16 %v1913_v22, %v1911_v15  ;;  %v2493_v15 = vpack.c.bf16 %v1922_v7, %v1920_v6  ;;  %v2494_v22 = vpack.c.bf16 %v1926_v43, %v1924_v8  ;;  %v2495_v7 = vpack.c.bf16 %v1931_v38, %v1929_v33 }
  0x93   :  { %v2078_v46 = vld [vmem:[#allocation7 + $0x670] sm:$0xff]  ;;  %v2082_v59 = vld [vmem:[#allocation7 + $0x6a8] sm:$0xff]  ;;  %v2084_v51 = vld [vmem:[#allocation7 + $0x698] sm:$0xff]  ;;  %1453 = vmatpush1.bf16.msra.mxu1 %v2492_v41 }
  0x94   :  { %2472 = vst [vmem:[#allocation44_spill] sm:$0xff] %v2084_v51  ;;  %v2086_v23 = vld [vmem:[#allocation7 + $0x6b8] sm:$0xff]  ;;  %v2096_v16 = vld [vmem:[#allocation7 + $0x680] sm:$0xff]  ;;  %v2100_v0 = vld [vmem:[#allocation7 + $0x690] sm:$0xff]  ;;  %1325 = vmatpush1.bf16.msra.mxu0 %v2491_v40  ;;  %1455 = vmatprep.subr.bf16.mxu1 %v2494_v22 }
  0x95   :  { %2473 = vst [vmem:[#allocation45_spill] sm:$0xff] %v2086_v23  ;;  %v2098_v17 = vld [vmem:[#allocation7 + $0x6a0] sm:$0xff]  ;;  %v2102_v1 = vld [vmem:[#allocation7 + $0x6b0] sm:$0xff]  ;;  %v2104_v14 = vld [vmem:[#allocation7 + $0x6c8] sm:$0xff]  ;;  %1327 = vmatprep.subr.bf16.mxu0 %v2493_v15 }
  0x96   :  { %v2106_v12 = vld [vmem:[#allocation7 + $0x6e8] sm:$0xff]  ;;  %v2120_v54 = vld [vmem:[#allocation7 + $0x6d8] sm:$0xff]  ;;  %v2124_v53 = vld [vmem:[#allocation7 + $0x6c0] sm:$0xff] }
  0x97   :  { %v2122_v20 = vld [vmem:[#allocation7 + $0x6f8] sm:$0xff]  ;;  %2476 = vst [vmem:[#allocation46_spill] sm:$0xff] %v2124_v53  ;;  %v2126_v44 = vld [vmem:[#allocation7 + $0x6e0] sm:$0xff]  ;;  %v2128_v24 = vld [vmem:[#allocation7 + $0x6d0] sm:$0xff] }
  0x98   :  { %2477 = vst [vmem:[#allocation47_spill] sm:$0xff] %v2128_v24  ;;  %v2130_v25 = vld [vmem:[#allocation7 + $0x6f0] sm:$0xff]  ;;  %v2144_v34 = vld [vmem:[#allocation7 + $0x708] sm:$0xff]  ;;  %v2148_v37 = vld [vmem:[#allocation7 + $0x718] sm:$0xff]  ;;  %1329 = vmatpush1.bf16.msra.mxu0 %v2495_v7 }
  0x99   :  { %2478 = vst [vmem:[#allocation48_spill] sm:$0xff] %v2130_v25  ;;  %2481 = vst [vmem:[#allocation49_spill] sm:$0xff] %v2144_v34  ;;  %v2146_v42 = vld [vmem:[#allocation7 + $0x728] sm:$0xff]  ;;  %v2150_v3 = vld [vmem:[#allocation7 + $0x738] sm:$0xff] }
  0x9a   :  { %2482 = vst [vmem:[#allocation50_spill] sm:$0xff] %v2146_v42  ;;  %2483 = vst [vmem:[#allocation51_spill] sm:$0xff] %v2148_v37  ;;  %v2152_v4 = vld [vmem:[#allocation7 + $0x700] sm:$0xff]  ;;  %v2156_v63 = vld [vmem:[#allocation7 + $0x710] sm:$0xff] }
  0x9b   :  { %2484 = vst [vmem:[#allocation52_spill] sm:$0xff] %v2150_v3  ;;  %2485 = vst [vmem:[#allocation53_spill] sm:$0xff] %v2152_v4  ;;  %v2154_v61 = vld [vmem:[#allocation7 + $0x720] sm:$0xff]  ;;  %v2166_v30 = vld [vmem:[#allocation7 + $0x730] sm:$0xff] }
  0x9c   :  { %2486 = vst [vmem:[#allocation54_spill] sm:$0xff] %v2154_v61  ;;  %2487 = vst [vmem:[#allocation55_spill] sm:$0xff] %v2156_v63  ;;  %v2168_v18 = vld [vmem:[#allocation7 + $0x748] sm:$0xff]  ;;  %v62_v36 = vld [vmem:[#allocation4 + $0x18] sm:$0xff] }
  0x9d   :  { %2488 = vst [vmem:[#allocation56_spill] sm:$0xff] %v2166_v30  ;;  %2489 = vst [vmem:[#allocation57_spill] sm:$0xff] %v2168_v18  ;;  %v2170_v39 = vld [vmem:[#allocation7 + $0x768] sm:$0xff]  ;;  %v66_v50 = vld [vmem:[#allocation4 + $0x38] sm:$0xff]  ;;  %v130_v25 = vmax.f32 %v62_v36, 0.0 }
  0x9e   :  { %2490 = vst [vmem:[#allocation58_spill] sm:$0xff] %v2170_v39  ;;  %v70_v29 = vld [vmem:[#allocation4 + $0x58] sm:$0xff]  ;;  %v134_v6 = vmax.f32 %v66_v50, 0.0  ;;  %v2496_v8 = vld [vmem:[#allocation13_spill] sm:$0xff]  ;;  %v2499_v18 = vld [vmem:[#allocation14_spill] sm:$0xff] }
  0x9f   :  { %v74_v57 = vld [vmem:[#allocation4 + $0x78] sm:$0xff]  ;;  %v138_v34 = vmax.f32 %v70_v29, 0.0  ;;  %v2497_v4 = vpack.c.bf16 %v1935_v9, %v2496_v8  ;;  %v2501_v36 = vld [vmem:[#allocation17_spill] sm:$0xff]  ;;  %v2226_v42 = vld [vmem:[#allocation4 + $0x10] sm:$0xff] }
  0xa0   :  { %v78_v51 = vld [vmem:[#allocation4 + $0x98] sm:$0xff]  ;;  %v142_v63 = vmax.f32 %v74_v57, 0.0 }
  0xa1   :  { %v82_v23 = vld [vmem:[#allocation4 + $0xb8] sm:$0xff]  ;;  %1457 = vmatpush1.bf16.msra.mxu1 %v2497_v4  ;;  %v146_v30 = vmax.f32 %v78_v51, 0.0 }
  0xa2   :  { %v86_v41 = vld [vmem:[#allocation4 + $0xd8] sm:$0xff]  ;;  %v150_v61 = vmax.f32 %v82_v23, 0.0  ;;  %v240_v8 = vadd.f32 %v142_v63, %v138_v34 }
  0xa3   :  { %v90_v21 = vld [vmem:[#allocation4 + $0xf8] sm:$0xff]  ;;  %v154_v37 = vmax.f32 %v86_v41, 0.0  ;;  %v212_v41 = vadd.f32 %v134_v6, %v130_v25  ;;  %v2513_v25 = vld [vmem:[#allocation25_spill] sm:$0xff] }
  0xa4   :  { %v94_v62 = vld [vmem:[#allocation4 + $0x118] sm:$0xff]  ;;  %v158_v3 = vmax.f32 %v90_v21, 0.0  ;;  %v268_v53 = vadd.f32 %v150_v61, %v146_v30  ;;  %v241_v63 = vrot.slane %v240_v8, 4 }
  0xa5   :  { %v98_v15 = vld [vmem:[#allocation4 + $0x138] sm:$0xff]  ;;  %v162_v33 = vmax.f32 %v94_v62, 0.0  ;;  %v213_v61 = vrot.slane %v212_v41, 4 }
  0xa6   :  { %v102_v22 = vld [vmem:[#allocation4 + $0x158] sm:$0xff]  ;;  %v166_v38 = vmax.f32 %v98_v15, 0.0  ;;  %v296_v62 = vadd.f32 %v158_v3, %v154_v37  ;;  %v269_v6 = vrot.slane %v268_v53, 4 }
  0xa7   :  { %v106_v5 = vld [vmem:[#allocation4 + $0x178] sm:$0xff]  ;;  %v170_v7 = vmax.f32 %v102_v22, 0.0  ;;  %v214_v3 = vadd.f32 %v213_v61, %v212_v41 }
  0xa8   :  { %v110_v2 = vld [vmem:[#allocation4 + $0x198] sm:$0xff]  ;;  %v174_v9 = vmax.f32 %v106_v5, 0.0  ;;  %v324_v15 = vadd.f32 %v166_v38, %v162_v33  ;;  %v129_v5 = vmax.f32 %v2226_v42, 0.0  ;;  %v242_v33 = vadd.f32 %v241_v63, %v240_v8 }
  0xa9   :  { %v114_v55 = vld [vmem:[#allocation4 + $0x1b8] sm:$0xff]  ;;  %v178_v4 = vmax.f32 %v110_v2, 0.0  ;;  %v270_v38 = vadd.f32 %v269_v6, %v268_v53  ;;  %v2552_v42 = vpack.c.bf16 %v2082_v59, %v2080_v49  ;;  %v2556_v49 = vpack.c.bf16 %v2098_v17, %v2096_v16 }
  0xaa   :  { %v118_v24 = vld [vmem:[#allocation4 + $0x1d8] sm:$0xff]  ;;  %v182_v57 = vmax.f32 %v114_v55, 0.0  ;;  %v352_v22 = vadd.f32 %v174_v9, %v170_v7  ;;  %v2511_v55 = vld [vmem:[#allocation22_spill] sm:$0xff]  ;;  %v243_v41 = vrot.slane %v242_v33, 2  ;;  %v2557_v59 = vpack.c.bf16 %v2102_v1, %v2100_v0 }
  0xab   :  { %v122_v43 = vld [vmem:[#allocation4 + $0x1f8] sm:$0xff]  ;;  %v186_v51 = vmax.f32 %v118_v24, 0.0  ;;  %v271_v8 = vrot.slane %v270_v38, 2 }
  0xac   :  { %v2498_v40 = vld [vmem:[#allocation15_spill] sm:$0xff]  ;;  %v2502_v50 = vld [vmem:[#allocation16_spill] sm:$0xff]  ;;  %v190_v23 = vmax.f32 %v122_v43, 0.0  ;;  %v380_v43 = vadd.f32 %v182_v57, %v178_v4  ;;  %v2522_v57 = vpack.c.bf16 %v1992_v52, %v1990_v35  ;;  %v2528_v52 = vld [vmem:[#allocation34_spill] sm:$0xff] }
  0xad   :  { %v2500_v39 = vpack.c.bf16 %v2498_v40, %v2499_v18  ;;  %v2503_v29 = vpack.c.bf16 %v2501_v36, %v2502_v50  ;;  %v2504_v18 = vld [vmem:[#allocation19_spill] sm:$0xff]  ;;  %v2507_v36 = vld [vmem:[#allocation21_spill] sm:$0xff]  ;;  %v2508_v50 = vld [vmem:[#allocation20_spill] sm:$0xff] }
  0xae   :  { %v2509_v21 = vpack.c.bf16 %v2507_v36, %v2508_v50  ;;  %v2510_v2 = vld [vmem:[#allocation23_spill] sm:$0xff]  ;;  %v2514_v34 = vld [vmem:[#allocation24_spill] sm:$0xff]  ;;  %v408_v37 = vadd.f32 %v190_v23, %v186_v51  ;;  %v381_v7 = vrot.slane %v380_v43, 4  ;;  %v2519_v50 = vld [vmem:[#allocation29_spill] sm:$0xff]  ;;  %v215_v23 = vrot.slane %v214_v3, 2 }
  0xaf   :  { %1331 = vmatprep.subr.bf16.mxu0 %v2500_v39  ;;  %1459 = vmatprep.subr.bf16.mxu1 %v2503_v29  ;;  %v2505_v39 = vld [vmem:[#allocation18_spill] sm:$0xff]  ;;  %v2512_v24 = vpack.c.bf16 %v2510_v2, %v2511_v55  ;;  %v2515_v30 = vpack.c.bf16 %v2513_v25, %v2514_v34  ;;  %v297_v29 = vrot.slane %v296_v62, 4  ;;  %v2516_v9 = vld [vmem:[#allocation27_spill] sm:$0xff] }
  0xb0   :  { %v2506_v40 = vpack.c.bf16 %v2504_v18, %v2505_v39  ;;  %1461 = vmatpush1.bf16.msra.mxu1 %v2509_v21  ;;  %v325_v18 = vrot.slane %v324_v15, 4  ;;  %v353_v39 = vrot.slane %v352_v22, 4  ;;  %v2520_v21 = vld [vmem:[#allocation28_spill] sm:$0xff]  ;;  %v409_v4 = vrot.slane %v408_v37, 4  ;;  %v2523_v51 = vld [vmem:[#allocation30_spill] sm:$0xff] }
  0xb1   :  { %1463 = vmatprep.subr.bf16.mxu1 %v2515_v30  ;;  %v2521_v2 = vpack.c.bf16 %v2519_v50, %v2520_v21  ;;  %v298_v55 = vadd.f32 %v297_v29, %v296_v62  ;;  %v2524_v53 = vpack.c.bf16 %v1996_v28, %v2523_v51  ;;  %v382_v34 = vadd.f32 %v381_v7, %v380_v43 }
  0xb2   :  { %1333 = vmatpush1.bf16.msra.mxu0 %v2506_v40  ;;  %v2517_v40 = vld [vmem:[#allocation26_spill] sm:$0xff]  ;;  %v354_v25 = vadd.f32 %v353_v39, %v352_v22  ;;  %v410_v6 = vadd.f32 %v409_v4, %v408_v37  ;;  %v216_v62 = vadd.f32 %v215_v23, %v214_v3  ;;  %v272_v22 = vadd.f32 %v271_v8, %v270_v38  ;;  %v2526_v39 = vld [vmem:[#allocation31_spill] sm:$0xff]  ;;  %v2533_v8 = vld [vmem:[#allocation36_spill] sm:$0xff] }
  0xb3   :  { %1335 = vmatprep.subr.bf16.mxu0 %v2512_v24  ;;  %v2518_v36 = vpack.c.bf16 %v2516_v9, %v2517_v40  ;;  %v326_v24 = vadd.f32 %v325_v18, %v324_v15  ;;  %v299_v30 = vrot.slane %v298_v55, 2  ;;  %v244_v15 = vadd.f32 %v243_v41, %v242_v33  ;;  %v2525_v18 = vld [vmem:[#allocation32_spill] sm:$0xff]  ;;  %v2529_v9 = vld [vmem:[#allocation33_spill] sm:$0xff] }
  0xb4   :  { %1465 = vmatpush1.bf16.msra.mxu1 %v2521_v2  ;;  %v355_v63 = vrot.slane %v354_v25, 2  ;;  %v383_v29 = vrot.slane %v382_v34, 2  ;;  %v2527_v35 = vpack.c.bf16 %v2525_v18, %v2526_v39  ;;  %v2530_v28 = vpack.c.bf16 %v2528_v52, %v2529_v9  ;;  %v85_v18 = vld [vmem:[#allocation4 + $0xd0] sm:$0xff] }
  0xb5   :  { %1467 = vmatprep.subr.bf16.mxu1 %v2524_v53  ;;  %v327_v61 = vrot.slane %v326_v24, 2  ;;  %v300_v40 = vadd.f32 %v299_v30, %v298_v55  ;;  %v411_v43 = vrot.slane %v410_v6, 2  ;;  %v2531_v7 = vpack.c.bf16 %v2014_v27, %v2012_v26  ;;  %v65_v55 = vld [vmem:[#allocation4 + $0x30] sm:$0xff] }
  0xb6   :  { %1337 = vmatpush1.bf16.msra.mxu0 %v2518_v36  ;;  %v356_v50 = vadd.f32 %v355_v63, %v354_v25  ;;  %v2532_v37 = vpack.c.bf16 %v2018_v32, %v2016_v31  ;;  %v217_v3 = vrot.slane %v216_v62, 1  ;;  %v245_v33 = vrot.slane %v244_v15, 1  ;;  %v73_v26 = vld [vmem:[#allocation4 + $0x70] sm:$0xff] }
  0xb7   :  { %1339 = vmatprep.subr.bf16.mxu0 %v2522_v57  ;;  %v328_v36 = vadd.f32 %v327_v61, %v326_v24  ;;  %v273_v38 = vrot.slane %v272_v22, 1  ;;  %v384_v21 = vadd.f32 %v383_v29, %v382_v34  ;;  %v301_v2 = vrot.slane %v300_v40, 1  ;;  %v69_v24 = vld [vmem:[#allocation4 + $0x50] sm:$0xff] }
  0xb8   :  { %1469 = vmatpush1.bf16.msra.mxu1 %v2530_v28  ;;  %v357_v57 = vrot.slane %v356_v50, 1  ;;  %v412_v51 = vadd.f32 %v411_v43, %v410_v6  ;;  %v218_v25 = vadd.f32 %v217_v3, %v216_v62  ;;  %v246_v53 = vadd.f32 %v245_v33, %v244_v15  ;;  %v77_v27 = vld [vmem:[#allocation4 + $0x90] sm:$0xff]  ;;  %v2537_v15 = vld [vmem:[#allocation37_spill] sm:$0xff] }
  0xb9   :  { %1471 = vmatprep.subr.bf16.mxu1 %v2532_v37  ;;  %v329_v4 = vrot.slane %v328_v36, 1  ;;  %v274_v23 = vadd.f32 %v273_v38, %v272_v22  ;;  %v385_v41 = vrot.slane %v384_v21, 1  ;;  %v2534_v30 = vld [vmem:[#allocation35_spill] sm:$0xff]  ;;  %v2536_v32 = vpack.c.bf16 %v2032_v48, %v2030_v56 }
  0xba   :  { %1341 = vmatpush1.bf16.msra.mxu0 %v2527_v35  ;;  %v2535_v31 = vpack.c.bf16 %v2533_v8, %v2534_v30  ;;  %v302_v34 = vadd.f32 %v301_v2, %v300_v40  ;;  %v358_v63 = vadd.f32 %v357_v57, %v356_v50  ;;  %v413_v6 = vrot.slane %v412_v51, 1  ;;  %v81_v29 = vld [vmem:[#allocation4 + $0xb0] sm:$0xff]  ;;  %v2545_v8 = vld [vmem:[#allocation40_spill] sm:$0xff] }
  0xbb   :  { %1343 = vmatprep.subr.bf16.mxu0 %v2531_v7  ;;  %v330_v61 = vadd.f32 %v329_v4, %v328_v36  ;;  %v89_v62 = vld [vmem:[#allocation4 + $0xf0] sm:$0xff]  ;;  %v2538_v22 = vpack.c.bf16 %v2036_v19, %v2537_v15  ;;  %v386_v9 = vadd.f32 %v385_v41, %v384_v21  ;;  %v475_v28 = vsel %vm447_vm0, %v246_v53, %v218_v25 }
  0xbc   :  { %1473 = vmatpush1.bf16.msra.mxu1 %v2536_v32  ;;  %v2539_v39 = vld [vmem:[#allocation39_spill] sm:$0xff]  ;;  %v2540_v35 = vld [vmem:[#allocation38_spill] sm:$0xff]  ;;  %v133_v36 = vmax.f32 %v65_v55, 0.0  ;;  %v137_v50 = vmax.f32 %v69_v24, 0.0  ;;  %v414_v43 = vadd.f32 %v413_v6, %v412_v51  ;;  %v476_v7 = vsel %vm449_vm1, %v274_v23, %v475_v28 }
  0xbd   :  { %v2541_v52 = vpack.c.bf16 %v2539_v39, %v2540_v35  ;;  %v93_v48 = vld [vmem:[#allocation4 + $0x110] sm:$0xff]  ;;  %v141_v19 = vmax.f32 %v73_v26, 0.0  ;;  %v145_v38 = vmax.f32 %v77_v27, 0.0  ;;  %v477_v2 = vsel %vm451_vm2, %v302_v34, %v476_v7  ;;  %v2544_v27 = vld [vmem:[#allocation41_spill] sm:$0xff] }
  0xbe   :  { %1345 = vmatpush1.bf16.msra.mxu0 %v2535_v31  ;;  %v97_v56 = vld [vmem:[#allocation4 + $0x130] sm:$0xff]  ;;  %v149_v21 = vmax.f32 %v81_v29, 0.0  ;;  %v153_v41 = vmax.f32 %v85_v18, 0.0  ;;  %v157_v25 = vmax.f32 %v89_v62, 0.0  ;;  %v2542_v53 = vpack.c.bf16 %v2050_v47, %v2048_v60 }
  0xbf   :  { %1347 = vmatprep.subr.bf16.mxu0 %v2538_v22  ;;  %1475 = vmatprep.subr.bf16.mxu1 %v2541_v52  ;;  %v101_v40 = vld [vmem:[#allocation4 + $0x150] sm:$0xff]  ;;  %v2543_v51 = vpack.c.bf16 %v2054_v10, %v2052_v13  ;;  %v478_v55 = vsel %vm453_vm3, %v330_v61, %v477_v2  ;;  %v161_v24 = vmax.f32 %v93_v48, 0.0  ;;  %v165_v23 = vmax.f32 %v97_v56, 0.0  ;;  %v2554_v56 = vld [vmem:[#allocation44_spill] sm:$0xff] }
  0xc0   :  { %v105_v37 = vld [vmem:[#allocation4 + $0x170] sm:$0xff]  ;;  %v169_v26 = vmax.f32 %v101_v40, 0.0  ;;  %v2546_v30 = vpack.c.bf16 %v2544_v27, %v2545_v8  ;;  %v479_v47 = vsel %vm455_vm4, %v358_v63, %v478_v55  ;;  %v205_v18 = vadd.f32 %v133_v36, %v129_v5  ;;  %v2553_v5 = vld [vmem:[#allocation45_spill] sm:$0xff]  ;;  %v740_v2 = vld [vmem:[#allocation7 + $0x778] sm:$0xff] }
  0xc1   :  { %v109_v3 = vld [vmem:[#allocation4 + $0x190] sm:$0xff]  ;;  %1477 = vmatpush1.bf16.msra.mxu1 %v2543_v51  ;;  %v173_v60 = vmax.f32 %v105_v37, 0.0  ;;  %v480_v10 = vsel %vm457_vm5, %v386_v9, %v479_v47  ;;  %v233_v15 = vadd.f32 %v141_v19, %v137_v50  ;;  %v261_v22 = vadd.f32 %v149_v21, %v145_v38  ;;  %v736_v38 = vld [vmem:[#allocation7 + $0x758] sm:$0xff] }
  0xc2   :  { %v113_v33 = vld [vmem:[#allocation4 + $0x1b0] sm:$0xff]  ;;  %1349 = vmatpush1.bf16.msra.mxu0 %v2542_v53  ;;  %v177_v6 = vmax.f32 %v109_v3, 0.0  ;;  %v481_v62 = vsel %vm459_vm6, %v414_v43, %v480_v10  ;;  %v289_v39 = vadd.f32 %v157_v25, %v153_v41  ;;  %v2550_v35 = vpack.c.bf16 %v2074_v11, %v2072_v58 }
  0xc3   :  { %v117_v4 = vld [vmem:[#allocation4 + $0x1d0] sm:$0xff]  ;;  %1351 = vmatprep.subr.bf16.mxu0 %v2546_v30  ;;  %v181_v29 = vmax.f32 %v113_v33, 0.0  ;;  %v2551_v63 = vpack.c.bf16 %v2078_v46, %v2076_v45  ;;  %v206_v52 = vrot.slane %v205_v18, 4  ;;  %v317_v9 = vadd.f32 %v165_v23, %v161_v24  ;;  %914 = vmatprep.mubr.f32.mxu0 %v481_v62 }
  0xc4   :  { %v121_v57 = vld [vmem:[#allocation4 + $0x1f0] sm:$0xff]  ;;  %v185_v13 = vmax.f32 %v117_v4, 0.0  ;;  %v345_v28 = vadd.f32 %v173_v60, %v169_v26  ;;  %v2555_v40 = vpack.c.bf16 %v2553_v5, %v2554_v56  ;;  %v234_v36 = vrot.slane %v233_v15, 4  ;;  %1056 = vmatprep.mubr.f32.mxu1 %v481_v62 }
  0xc5   :  { %v2547_v31 = vld [vmem:[#allocation43_spill] sm:$0xff]  ;;  %v2548_v32 = vld [vmem:[#allocation42_spill] sm:$0xff]  ;;  %v189_v61 = vmax.f32 %v121_v57, 0.0  ;;  %v373_v48 = vadd.f32 %v181_v29, %v177_v6  ;;  %v262_v50 = vrot.slane %v261_v22, 4  ;;  %v290_v58 = vrot.slane %v289_v39, 4 }
  0xc6   :  { %v2549_v34 = vpack.c.bf16 %v2547_v31, %v2548_v32  ;;  %1353 = vmatpush1.bf16.msra.mxu0 %v2550_v35  ;;  %v207_v45 = vadd.f32 %v206_v52, %v205_v18  ;;  %v318_v46 = vrot.slane %v317_v9, 4  ;;  %v346_v43 = vrot.slane %v345_v28, 4  ;;  %v2560_v31 = vld [vmem:[#allocation46_spill] sm:$0xff]  ;;  %v2563_v32 = vld [vmem:[#allocation47_spill] sm:$0xff]  ;;  %v2568_v18 = vld [vmem:[#allocation52_spill] sm:$0xff] }
  0xc7   :  { %1355 = vmatprep.subr.bf16.mxu0 %v2552_v42  ;;  %v401_v11 = vadd.f32 %v189_v61, %v185_v13  ;;  %v374_v7 = vrot.slane %v373_v48, 4  ;;  %v235_v37 = vadd.f32 %v234_v36, %v233_v15  ;;  %v263_v3 = vadd.f32 %v262_v50, %v261_v22  ;;  %v2565_v10 = vld [vmem:[#allocation50_spill] sm:$0xff]  ;;  %v2566_v13 = vld [vmem:[#allocation49_spill] sm:$0xff]  ;;  %v2569_v62 = vld [vmem:[#allocation51_spill] sm:$0xff] }
  0xc8   :  { %1479 = vmatprep.subr.bf16.mxu1 %v2549_v34  ;;  %v291_v33 = vadd.f32 %v290_v58, %v289_v39  ;;  %v208_v4 = vrot.slane %v207_v45, 2  ;;  %v319_v57 = vadd.f32 %v318_v46, %v317_v9  ;;  %v347_v21 = vadd.f32 %v346_v43, %v345_v28  ;;  %v737_v34 = vld [vmem:[#allocation7 + $0x760] sm:$0xff]  ;;  %v739_v22 = vld [vmem:[#allocation7 + $0x770] sm:$0xff]  ;;  %v742_v39 = vld [vmem:[#allocation7 + $0x788] sm:$0xff] }
  0xc9   :  { %1481 = vmatpush1.bf16.msra.mxu1 %v2551_v63  ;;  %v402_v19 = vrot.slane %v401_v11, 4  ;;  %v375_v41 = vadd.f32 %v374_v7, %v373_v48  ;;  %v2558_v25 = vpack.c.bf16 %v2106_v12, %v2104_v14  ;;  %v2559_v53 = vpack.c.bf16 %v2122_v20, %v2120_v54  ;;  %v2562_v14 = vld [vmem:[#allocation48_spill] sm:$0xff]  ;;  %v746_v28 = vld [vmem:[#allocation7 + $0x7a8] sm:$0xff] }
  0xca   :  { %1483 = vmatprep.subr.bf16.mxu1 %v2555_v40  ;;  %1357 = vmatpush1.bf16.msra.mxu0 %v2556_v49  ;;  %v236_v16 = vrot.slane %v235_v37, 2  ;;  %v264_v17 = vrot.slane %v263_v3, 2  ;;  %v292_v51 = vrot.slane %v291_v33, 2  ;;  %v209_v0 = vadd.f32 %v208_v4, %v207_v45  ;;  %v733_v20 = vld [vmem:[#allocation7 + $0x740] sm:$0xff]  ;;  %v744_v48 = vld [vmem:[#allocation7 + $0x798] sm:$0xff]  ;;  %v2571_v45 = vld [vmem:[#allocation54_spill] sm:$0xff] }
  0xcb   :  { %1359 = vmatprep.subr.bf16.mxu0 %v2558_v25  ;;  %v403_v55 = vadd.f32 %v402_v19, %v401_v11  ;;  %v320_v1 = vrot.slane %v319_v57, 2  ;;  %v348_v24 = vrot.slane %v347_v21, 2  ;;  %v376_v23 = vrot.slane %v375_v41, 2  ;;  %v748_v42 = vld [vmem:[#allocation7 + $0x7b8] sm:$0xff]  ;;  %v2572_v46 = vld [vmem:[#allocation53_spill] sm:$0xff]  ;;  %v743_v25 = vld [vmem:[#allocation7 + $0x790] sm:$0xff] }
  0xcc   :  { %v1494_v26 = vpack.c.bf16 %v740_v2, %v736_v38  ;;  %v237_v27 = vadd.f32 %v236_v16, %v235_v37  ;;  %v265_v8 = vadd.f32 %v264_v17, %v263_v3  ;;  %v293_v30 = vadd.f32 %v292_v51, %v291_v33  ;;  %v2574_v7 = vld [vmem:[#allocation56_spill] sm:$0xff]  ;;  %v2575_v37 = vld [vmem:[#allocation55_spill] sm:$0xff]  ;;  %v2577_v2 = vld [vmem:[#allocation58_spill] sm:$0xff] }
  0xcd   :  { %1485 = vmatpush1.bf16.msra.mxu1 %v2557_v59  ;;  %v2561_v12 = vpack.c.bf16 %v2126_v44, %v2560_v31  ;;  %v2564_v54 = vpack.c.bf16 %v2562_v14, %v2563_v32  ;;  %v210_v47 = vrot.slane %v209_v0, 1  ;;  %v321_v60 = vadd.f32 %v320_v1, %v319_v57  ;;  %v735_v44 = vld [vmem:[#allocation7 + $0x750] sm:$0xff]  ;;  %v741_v19 = vld [vmem:[#allocation7 + $0x780] sm:$0xff]  ;;  %v750_v16 = vld [vmem:[#allocation7 + $0x7c8] sm:$0xff] }
  0xce   :  { %1487 = vmatprep.subr.bf16.mxu1 %v2559_v53  ;;  %v349_v6 = vadd.f32 %v348_v24, %v347_v21  ;;  %v404_v29 = vrot.slane %v403_v55, 2  ;;  %v2567_v61 = vpack.c.bf16 %v2565_v10, %v2566_v13  ;;  %v2570_v15 = vpack.c.bf16 %v2568_v18, %v2569_v62  ;;  %v745_v49 = vld [vmem:[#allocation7 + $0x7a0] sm:$0xff]  ;;  %v747_v53 = vld [vmem:[#allocation7 + $0x7b0] sm:$0xff]  ;;  %v752_v1 = vld [vmem:[#allocation7 + $0x7d8] sm:$0xff] }
  0xcf   :  { %1361 = vmatpush1.bf16.msra.mxu0 %v2561_v12  ;;  %v238_v35 = vrot.slane %v237_v27, 1  ;;  %v266_v63 = vrot.slane %v265_v8, 1  ;;  %v294_v52 = vrot.slane %v293_v30, 1  ;;  %v377_v9 = vadd.f32 %v376_v23, %v375_v41  ;;  %v2578_v4 = vld [vmem:[#allocation57_spill] sm:$0xff]  ;;  %v756_v24 = vld [vmem:[#allocation7 + $0x7f8] sm:$0xff] }
  0xd0   :  { %1363 = vmatprep.subr.bf16.mxu0 %v2567_v61  ;;  %v211_v5 = vadd.f32 %v210_v47, %v209_v0  ;;  %v322_v56 = vrot.slane %v321_v60, 1  ;;  %v350_v40 = vrot.slane %v349_v6, 1  ;;  %v1368_v36 = vpack.c.bf16 %v737_v34, %v733_v20  ;;  %v754_v0 = vld [vmem:[#allocation7 + $0x7e8] sm:$0xff]  ;;  %v751_v20 = vld [vmem:[#allocation7 + $0x7d0] sm:$0xff] }
  0xd1   :  { %1489 = vmatpush1.bf16.msra.mxu1 %v2564_v54  ;;  %v239_v50 = vadd.f32 %v238_v35, %v237_v27  ;;  %v267_v58 = vadd.f32 %v266_v63, %v265_v8  ;;  %v295_v11 = vadd.f32 %v294_v52, %v293_v30  ;;  %v2573_v43 = vpack.c.bf16 %v2571_v45, %v2572_v46  ;;  %v749_v30 = vld [vmem:[#allocation7 + $0x7c0] sm:$0xff]  ;;  %v755_v34 = vld [vmem:[#allocation7 + $0x7f0] sm:$0xff]  ;;  %v1068_v63 = vld [vmem:[#allocation3] sm:$0x1] }
  0xd2   :  { %1491 = vmatprep.subr.bf16.mxu1 %v2570_v15  ;;  %v2576_v3 = vpack.c.bf16 %v2574_v7, %v2575_v37  ;;  %v1496_v33 = vpack.c.bf16 %v739_v22, %v735_v44  ;;  %v323_v59 = vadd.f32 %v322_v56, %v321_v60  ;;  %v405_v38 = vadd.f32 %v404_v29, %v403_v55  ;;  %v753_v54 = vld [vmem:[#allocation7 + $0x7e0] sm:$0xff] }
  0xd3   :  { %1365 = vmatpush1.bf16.msra.mxu0 %v2573_v43  ;;  %v2579_v57 = vpack.c.bf16 %v2577_v2, %v2578_v4  ;;  %v1370_v21 = vpack.c.bf16 %v746_v28, %v742_v39  ;;  %v1498_v41 = vpack.c.bf16 %v748_v42, %v744_v48  ;;  %v378_v17 = vrot.slane %v377_v9, 1  ;;  %v1067_v15 = vld [vmem:[%s2371_s3] sm:$0xf]  ;;  %1516 = vpush %v1068_v63  ;;  %s1599_s3 = smov [#allocation9]  }
  0xd4   :  { %v468_v51 = vsel %vm447_vm0, %v239_v50, %v211_v5  ;;  %v351_v23 = vadd.f32 %v350_v40, %v349_v6  ;;  %v1372_v8 = vpack.c.bf16 %v745_v49, %v741_v19  ;;  %v406_v31 = vrot.slane %v405_v38, 1  ;;  %v757_v28 = vld [vmem:[%s2370_s2] sm:$0xf]  ;;  %s1240_s22 = sshll.u32 %s1599_s3, 4  ;;  %s1241_s22 = int_to_ptr.vmem [resolvable:$true] %s1240_s22 }
  0xd5   :  { %1493 = vmatpush1.bf16.msra.mxu1 %v2576_v3  ;;  %1367 = vmatprep.subr.bf16.mxu0 %v2579_v57  ;;  %v469_v27 = vsel %vm449_vm1, %v267_v58, %v468_v51  ;;  %v1374_v14 = vpack.c.bf16 %v754_v0, %v750_v16  ;;  %v1502_v32 = vpack.c.bf16 %v756_v24, %v752_v1  ;;  %v759_v18 = vlaneseq  ;;  %s1567_s23 = scalar_lea.vmem %s1241_s22, 16  ;;  %s1571_s24 = scalar_lea.vmem %s1241_s22, 32 }
  0xd6   :  { %1495 = vmatprep.subr.bf16.mxu1 %v1494_v26  ;;  %v470_v55 = vsel %vm451_vm2, %v295_v11, %v469_v27  ;;  %v1500_v26 = vpack.c.bf16 %v747_v53, %v743_v25  ;;  %v379_v47 = vadd.f32 %v378_v17, %v377_v9  ;;  %v1376_v6 = vpack.c.bf16 %v753_v54, %v749_v30  ;;  %p1568_p2 = scmp.ne.s32.totalorder %s1241_s22, %s1567_s23  ;;  %p1572_p3 = scmp.lt.s32.totalorder %s1241_s22, %s1241_s22 }
  0xd7   :  { %1369 = vmatpush1.bf16.msra.mxu0 %v1368_v36  ;;  %v471_v12 = vsel %vm453_vm3, %v323_v59, %v470_v55  ;;  %v1504_v29 = vpack.c.bf16 %v755_v34, %v751_v20  ;;  %v407_v10 = vadd.f32 %v406_v31, %v405_v38  ;;  %v760_v62 = vshrl.u32 %v759_v18, 7  ;;  %p1573_p4 = scmp.lt.s32.totalorder %s1571_s24, %s1567_s23 }
  0xd8   :  { %1371 = vmatprep.subr.bf16.mxu0 %v1370_v21  ;;  %v472_v60 = vsel %vm455_vm4, %v351_v23, %v471_v12 }
  0xd9   :  { %1497 = vmatpush1.bf16.msra.mxu1 %v1496_v33  ;;  %v473_v13 = vsel %vm457_vm5, %v379_v47, %v472_v60  ;;  %v765_v44 = vsub.s32 1, %v760_v62  ;;  %v773_v22 = vsub.s32 3, %v760_v62  ;;  %v761_v52 = vsub.s32 0, %v760_v62  ;;  %p1574_p5 = por %p1573_p4, %p1572_p3 }
  0xda   :  { %1499 = vmatprep.subr.bf16.mxu1 %v1498_v41  ;;  %v474_v61 = vsel %vm459_vm6, %v407_v10, %v473_v13  ;;  %v769_v9 = vsub.s32 2, %v760_v62 }
  0xdb   :  { %1373 = vmatpush1.bf16.msra.mxu0 %v1372_v8  ;;  %v1079_v39 = vrot.slane %v1067_v15, %v765_v44  ;;  %v1087_v35 = vrot.slane %v1067_v15, %v773_v22  ;;  %v762_v48 = vrot.slane %v757_v28, %v761_v52  ;;  %v766_v5 = vrot.slane %v757_v28, %v765_v44  ;;  %p1575_p6 = pnand %p1574_p5, %p1568_p2 }
  0xdc   :  { %1375 = vmatprep.subr.bf16.mxu0 %v1374_v14  ;;  %v770_v42 = vrot.slane %v757_v28, %v769_v9  ;;  %v774_v56 = vrot.slane %v757_v28, %v773_v22  ;;  %v1075_v19 = vrot.slane %v1067_v15, %v761_v52  ;;  %v1083_v49 = vrot.slane %v1067_v15, %v769_v9 }
  0xdd   :  { %1501 = vmatpush1.bf16.msra.mxu1 %v1500_v26 }
  0xde   :  { %1503 = vmatprep.subr.bf16.mxu1 %v1502_v32 }
  0xdf   :  { %1377 = vmatpush1.bf16.msra.mxu0 %v1376_v6 }
  0xe1   :  { %1505 = vmatpush1.bf16.msra.mxu1 %v1504_v29 }
  0xe2   :  { %915 = vmatmul.mubr.f32.vlgmr.msra.gmra.mrb[0].mxu0 %v474_v61 }
  0xe3   :  { %1226 = vmatprep.mubr.f32.mxu0 %v1087_v35 }
  0xe4   :  { %1057 = vmatmul.mubr.f32.vlgmr.msra.gmra.mrb[0].mxu1 %v474_v61 }
  0xe5   :  { %1156 = vmatprep.mubr.f32.mxu1 %v1079_v39 }
 0x104   :  { %s1517_s2 = spop %1516 }
 0x105   :  { %v1070_v59 = vstv %s1517_s2 }
 0x1b5   :  { %v916_v40 = vpop.f32.mrb[0].mxu0 }
 0x1b6   :  { %v1506_v50 = vadd.f32 %v916_v40, %v762_v48  ;;  %v918_v11 = vpop.f32.mrb[1].mxu0 }
 0x1b7   :  { %v1058_v36 = vpop.f32.mrb[0].mxu1  ;;  %v1507_v46 = vadd.f32 %v918_v11, %v766_v5 }
 0x1b8   :  { %v1508_v58 = vadd.f32 %v1058_v36, %v770_v42  ;;  %v1060_v45 = vpop.f32.mrb[1].mxu1  ;;  %v1063_v3 = vmax.f32 %v1506_v50, 0.0 }
 0x1b9   :  { %v1509_v43 = vadd.f32 %v1060_v45, %v774_v56  ;;  %v1064_v7 = vmax.f32 %v1507_v46, 0.0 }
 0x1ba   :  { %v1065_v33 = vmax.f32 %v1508_v58, 0.0 }
 0x1bb   :  { %v1066_v37 = vmax.f32 %v1509_v43, 0.0  ;;  %1092 = vmatprep.subr.mxu1 %v1064_v7 }
 0x1bc   :  { %1093 = vmatpush1.xpose.msra.mxu1 %v1063_v3 }
 0x1bd   :  { %1162 = vmatprep.subr.mxu0 %v1066_v37 }
 0x1be   :  { %1163 = vmatpush1.xpose.msra.mxu0 %v1065_v33 }
 0x1bf   :  { %1157 = vmatmul.mubr.f32.vlgmr.msra.gmra.mrb[2].mxu1 %v1075_v19 }
 0x1c1   :  { %1227 = vmatmul.mubr.f32.vlgmr.msra.gmra.mrb[2].mxu0 %v1083_v49 }
 0x292   :  { %v1158_v38 = vpop.f32.mrb[2].mxu1 }
 0x293   :  { %v1159_v4 = vadd.f32 %v1158_v38, %v1070_v59  ;;  %v1160_v57 = vpop.f32.mrb[3].mxu1 }
 0x294   :  { %v1228_v2 = vpop.f32.mrb[2].mxu0 }
 0x295   :  { %v1230_v21 = vpop.f32.mrb[3].mxu0  ;;  %v1229_v41 = vadd.f32 %v1228_v2, %v1159_v4 }
 0x297   :  { %1233 = vst.msk [vmem:[#allocation9] sm:$0x1] %vm1232_vm7, %v1229_v41 }
 0x298   :  { %1578 = shalt.err (!%p1575_p6)
}
 0x299   :  { %s1579_s27 = scalar_lea.hbm %s2373_s5, 16 }
 0x29a   :  { %p1580_p7 = scmp.ne.s32.totalorder %s2373_s5, %s1579_s27  ;;  %p1583_p8 = scmp.lt.u32.totalorder %s1579_s27, %s2373_s5 }
 0x29c   :  { %p1585_p9 = pnand %p1583_p8, %p1580_p7 }
 0x29e   :  { %1588 = shalt.err (!%p1585_p9)
}
 0x29f   :  { %1243 = dma.vmem_to_hbm [thread:$0]  %s1241_s22, 16, %s2373_s5, [#allocation6]  }
 0x2a0   :  { %1593 = dma.done.wait [#allocation6], 16  }
 0x2a1   :  { %1594 = vsyncadd [#allocation6], 4294967280 }
 0x2a2   :  { %1247 = vsyncpa [#allocation5], 1 }
 0x2a3   :  { %1248 = vsyncpa [#allocation8], 1 }
 0x2a4   :  { %1249 = vsyncpa [#allocation6], 1 }

</bundles_post_ra>
